<compile_context>
chip_gen: v5e
topology: v5e:2x2
jax: 0.10.0
libtpu: 0.0.40
codegen_flags: <defaults>
</compile_context>

<pallas_src>
import jax
import jax.numpy as jnp
from jax.experimental import pallas as pl
from jax.experimental.pallas import tpu as pltpu


def _round_up(x, m):
    return ((x + m - 1) // m) * m


def _make_netd_pixel_kernel(n_chunks, sub):
    """Kernel over one (1, 256, tm) pixel tile, processed in `sub`-lane chunks."""

    def kernel(x_ref, w1_ref, w2_ref, w3_ref, o_ref):
        # x_ref:  (1, 256, tm)  input pixel tile (channels-major, pixels on lanes),
        #                       f32 or bf16 -- cast to bf16 happens below.
        # w1_ref: (256, 256)    conv1 weight (Cout, Cin), bf16 (resident)
        # w2_ref: (128, 256)    conv2 weight, bf16 (resident)
        # w3_ref: (1, 128)      conv3 weight, bf16 (resident)
        # o_ref:  (1, 1, tm)    f32 sigmoid output (lane-dense)
        def body(c, carry):
            start = pl.multiple_of(c * sub, sub)
            xs = x_ref[0, :, pl.ds(start, sub)].astype(jnp.bfloat16)       # (C, sub)
            h1 = jnp.dot(w1_ref[...], xs, preferred_element_type=jnp.float32)
            h1 = jnp.maximum(h1, 0.0).astype(jnp.bfloat16)                 # ReLU
            h2 = jnp.dot(w2_ref[...], h1, preferred_element_type=jnp.float32)
            h2 = jnp.maximum(h2, 0.0).astype(jnp.bfloat16)                 # ReLU
            logits = jnp.dot(w3_ref[...], h2, preferred_element_type=jnp.float32)
            o_ref[0, :, pl.ds(start, sub)] = (
                jax.nn.sigmoid(logits).astype(o_ref.dtype))                # Sigmoid
            return carry

        jax.lax.fori_loop(0, n_chunks, body, None, unroll=True)

    return kernel


def netd_pixel_forward(x_nchw, w1, w2, w3, *, tm=2048):
    """NetDPixel forward.

    x_nchw: (N, 256, H, W) float32 (or bfloat16 -- then the in-kernel cast is
            a no-op and the HBM read halves)
    w1: (256, 256)  conv1 weight, PyTorch (Cout, Cin) layout (1x1 squeezed)
    w2: (128, 256)  conv2 weight
    w3: (1, 128)    conv3 weight

    Returns sigmoid(conv3(relu(conv2(relu(conv1(x)))))) of shape (N, 1, H, W).
    """
    N, C, H, W = x_nchw.shape
    assert C == w1.shape[1], "channel mismatch"
    hw = H * W

    # Channels-major view: a free reshape of NCHW (no transpose, no cast, no pad).
    x = x_nchw.reshape(N, C, hw)

    # Pixel tile: clamp to the 128-rounded spatial extent.  A ragged last tile
    # is handled by Pallas' partial-block machinery: the out-of-bounds lanes
    # compute garbage sigmoids that are dropped on writeback, and since the
    # channel matmuls keep pixel columns fully independent, valid lanes are
    # unaffected.
    tm_eff = min(_round_up(tm, 128), _round_up(hw, 128))
    # Megacore (v7x has 2 TensorCores): ensure >= 2 grid steps when the
    # spatial extent allows splitting.
    if N * pl.cdiv(hw, tm_eff) < 2 and tm_eff > 128:
        tm_eff = max(128, _round_up(pl.cdiv(hw, 2), 128))
    n_tiles = pl.cdiv(hw, tm_eff)

    # In-kernel sub-chunk width (keeps f32 matmul outputs small between layers).
    if tm_eff % 512 == 0:
        sub = 512
    elif tm_eff % 256 == 0:
        sub = 256
    else:
        sub = 128
    n_chunks = tm_eff // sub

    # Weights are tiny and resident on every grid step: cast once in the wrapper.
    w1_bf = w1.astype(jnp.bfloat16)
    w2_bf = w2.astype(jnp.bfloat16)
    w3_bf = w3.astype(jnp.bfloat16)
    c_out = w3.shape[0]  # 1

    out = pl.pallas_call(
        _make_netd_pixel_kernel(n_chunks, sub),
        out_shape=jax.ShapeDtypeStruct((N, c_out, hw), jnp.float32),
        grid_spec=pltpu.PrefetchScalarGridSpec(
            num_scalar_prefetch=0,
            grid=(N, n_tiles),
            in_specs=[
                pl.BlockSpec((1, C, tm_eff), lambda n, j: (n, 0, j)),
                pl.BlockSpec(w1.shape, lambda n, j: (0, 0)),   # resident
                pl.BlockSpec(w2.shape, lambda n, j: (0, 0)),   # resident
                pl.BlockSpec(w3.shape, lambda n, j: (0, 0)),   # resident
            ],
            out_specs=pl.BlockSpec((1, c_out, tm_eff), lambda n, j: (n, 0, j)),
        ),
        compiler_params=pltpu.CompilerParams(
            dimension_semantics=("parallel", "parallel"),
            vmem_limit_bytes=48 << 20),
    )(x, w1_bf, w2_bf, w3_bf)

    return out.reshape(N, c_out, H, W)


def _reference(x_nchw, w1, w2, w3):
    # Pure-JAX f32 reference of the same forward (1x1 convs as matmuls).
    N, C, H, W = x_nchw.shape
    x = x_nchw.reshape(N, C, H * W)
    h = jnp.maximum(jnp.einsum("oc,ncp->nop", w1, x), 0.0)
    h = jnp.maximum(jnp.einsum("oc,ncp->nop", w2, h), 0.0)
    y = jax.nn.sigmoid(jnp.einsum("oc,ncp->nop", w3, h))
    return y.reshape(N, 1, H, W)


if __name__ == "__main__":
    key = jax.random.PRNGKey(0)
    k_x, k_w1, k_w2, k_w3 = jax.random.split(key, 4)

    # Channels fixed by the module (256 -> 256 -> 128 -> 1); keep batch /
    # spatial dims small: N=2, H=W=16.
    N, C, H, W = 2, 256, 16, 16
    x = jax.random.normal(k_x, (N, C, H, W), dtype=jnp.float32)

    # Deterministic normal(0, 0.01) init, matching _init_weights.
    # PyTorch conv weight (Cout, Cin, 1, 1) stored here as (Cout, Cin).
    w1 = 0.01 * jax.random.normal(k_w1, (256, 256), dtype=jnp.float32)
    w2 = 0.01 * jax.random.normal(k_w2, (128, 256), dtype=jnp.float32)
    w3 = 0.01 * jax.random.normal(k_w3, (1, 128), dtype=jnp.float32)

    out = jax.block_until_ready(netd_pixel_forward(x, w1, w2, w3))
    ref = jax.block_until_ready(_reference(x, w1, w2, w3))

    assert out.shape == (N, 1, H, W)
    # bf16 matmuls with f32 accumulation vs f32 reference: loosen tolerance.
    assert jnp.allclose(out, ref, atol=5e-3, rtol=1e-2), (
        float(jnp.max(jnp.abs(out - ref))))

    print("KERNEL_OK")
</pallas_src>

<mosaic_0001>
module attributes {stable_mosaic.version = 11 : i64} {
  func.func @kernel(%arg0: i32, %arg1: i32, %arg2: memref<1x256x256xf32, #tpu.memory_space<vmem>>, %arg3: memref<256x256xbf16, #tpu.memory_space<vmem>>, %arg4: memref<128x256xbf16, #tpu.memory_space<vmem>>, %arg5: memref<1x128xbf16, #tpu.memory_space<vmem>>, %arg6: memref<1x1x256xf32, #tpu.memory_space<vmem>>) attributes {dimension_semantics = [#tpu.dimension_semantics<parallel>, #tpu.dimension_semantics<parallel>], iteration_bounds = array<i64: 2, 1>, scalar_prefetch = 0 : i64, scratch_operands = 0 : i64, tpu.core_type = #tpu.core_type<tc>, window_params = [{transform_indices = @transform_0, window_bounds = array<i64: 1, 256, 256>}, {pipeline_mode = #tpu.pipeline_mode<synchronous>, transform_indices = @transform_1, window_bounds = array<i64: 256, 256>}, {pipeline_mode = #tpu.pipeline_mode<synchronous>, transform_indices = @transform_2, window_bounds = array<i64: 128, 256>}, {pipeline_mode = #tpu.pipeline_mode<synchronous>, transform_indices = @transform_3, window_bounds = array<i64: 1, 128>}, {transform_indices = @transform_4, window_bounds = array<i64: 1, 1, 256>}]} {
    %c0_i32 = arith.constant 0 : i32
    %c256_i32 = arith.constant 256 : i32
    %0 = arith.muli %c0_i32, %c256_i32 : i32
    %1 = tpu.assume_multiple %0, 256 : i32
    %c0 = arith.constant 0 : index
    %c0_0 = arith.constant 0 : index
    %2 = arith.index_cast %1 : i32 to index
    %3 = vector.load %arg2[%c0, %c0_0, %2] : memref<1x256x256xf32, #tpu.memory_space<vmem>>, vector<1x256x256xf32>
    %4 = vector.shape_cast %3 : vector<1x256x256xf32> to vector<256x256xf32>
    %5 = arith.truncf %4 : vector<256x256xf32> to vector<256x256xbf16>
    %c0_1 = arith.constant 0 : index
    %c0_2 = arith.constant 0 : index
    %6 = vector.load %arg3[%c0_1, %c0_2] : memref<256x256xbf16, #tpu.memory_space<vmem>>, vector<256x256xbf16>
    %cst = arith.constant dense<0.000000e+00> : vector<256x256xf32>
    %7 = tpu.matmul %6, %5, %cst {dimension_numbers = #tpu.dot_dimension_numbers<[1], [0], [0], [1], [0, 0, 1, 1], [], []>} : vector<256x256xbf16>, vector<256x256xbf16>, vector<256x256xf32> -> vector<256x256xf32>
    %cst_3 = arith.constant 0.000000e+00 : f32
    %8 = vector.broadcast %cst_3 : f32 to vector<256x256xf32>
    %9 = arith.maximumf %7, %8 : vector<256x256xf32>
    %10 = arith.truncf %9 : vector<256x256xf32> to vector<256x256xbf16>
    %c0_4 = arith.constant 0 : index
    %c0_5 = arith.constant 0 : index
    %11 = vector.load %arg4[%c0_4, %c0_5] : memref<128x256xbf16, #tpu.memory_space<vmem>>, vector<128x256xbf16>
    %cst_6 = arith.constant dense<0.000000e+00> : vector<128x256xf32>
    %12 = tpu.matmul %11, %10, %cst_6 {dimension_numbers = #tpu.dot_dimension_numbers<[1], [0], [0], [1], [0, 0, 1, 1], [], []>} : vector<128x256xbf16>, vector<256x256xbf16>, vector<128x256xf32> -> vector<128x256xf32>
    %cst_7 = arith.constant 0.000000e+00 : f32
    %13 = vector.broadcast %cst_7 : f32 to vector<128x256xf32>
    %14 = arith.maximumf %12, %13 : vector<128x256xf32>
    %15 = arith.truncf %14 : vector<128x256xf32> to vector<128x256xbf16>
    %c0_8 = arith.constant 0 : index
    %c0_9 = arith.constant 0 : index
    %16 = vector.load %arg5[%c0_8, %c0_9] : memref<1x128xbf16, #tpu.memory_space<vmem>>, vector<1x128xbf16>
    %cst_10 = arith.constant dense<0.000000e+00> : vector<1x256xf32>
    %17 = tpu.matmul %16, %15, %cst_10 {dimension_numbers = #tpu.dot_dimension_numbers<[1], [0], [0], [1], [0, 0, 1, 1], [], []>} : vector<1x128xbf16>, vector<128x256xbf16>, vector<1x256xf32> -> vector<1x256xf32>
    %18 = arith.negf %17 : vector<1x256xf32>
    %19 = math.exp %18 : vector<1x256xf32>
    %cst_11 = arith.constant 1.000000e+00 : f32
    %20 = vector.broadcast %cst_11 : f32 to vector<1x256xf32>
    %21 = arith.addf %20, %19 : vector<1x256xf32>
    %22 = arith.divf %20, %21 : vector<1x256xf32>
    %c0_12 = arith.constant 0 : index
    %c0_13 = arith.constant 0 : index
    %23 = arith.index_cast %1 : i32 to index
    %24 = vector.load %arg6[%c0_12, %c0_13, %23] : memref<1x1x256xf32, #tpu.memory_space<vmem>>, vector<1x1x256xf32>
    %25 = vector.shape_cast %24 : vector<1x1x256xf32> to vector<1x256xf32>
    %26 = vector.shape_cast %22 : vector<1x256xf32> to vector<1x1x256xf32>
    tpu.vector_store %arg6[%c0_12, %c0_13, %23], %26 {strides = array<i32>} : memref<1x1x256xf32, #tpu.memory_space<vmem>>, vector<1x1x256xf32>,
    %c1_i32 = arith.constant 1 : i32
    return
  }
  func.func @transform_0(%arg0: i32, %arg1: i32) -> (i32, i32, i32) {
    %c0_i32 = arith.constant 0 : i32
    %c0_i32_0 = arith.constant 0 : i32
    return %arg0, %c0_i32, %arg1 : i32, i32, i32
  }
  func.func @transform_1(%arg0: i32, %arg1: i32) -> (i32, i32) {
    %c0_i32 = arith.constant 0 : i32
    %c0_i32_0 = arith.constant 0 : i32
    %c0_i32_1 = arith.constant 0 : i32
    return %c0_i32, %c0_i32_0 : i32, i32
  }
  func.func @transform_2(%arg0: i32, %arg1: i32) -> (i32, i32) {
    %c0_i32 = arith.constant 0 : i32
    %c0_i32_0 = arith.constant 0 : i32
    %c0_i32_1 = arith.constant 0 : i32
    return %c0_i32, %c0_i32_0 : i32, i32
  }
  func.func @transform_3(%arg0: i32, %arg1: i32) -> (i32, i32) {
    %c0_i32 = arith.constant 0 : i32
    %c0_i32_0 = arith.constant 0 : i32
    %c0_i32_1 = arith.constant 0 : i32
    return %c0_i32, %c0_i32_0 : i32, i32
  }
  func.func @transform_4(%arg0: i32, %arg1: i32) -> (i32, i32, i32) {
    %c0_i32 = arith.constant 0 : i32
    %c0_i32_0 = arith.constant 0 : i32
    return %arg0, %c0_i32, %arg1 : i32, i32, i32
  }
}

</mosaic_0001>

<bundles_post_ra>
// kernel: tpu_custom_call.1
= control target key start
LH: loop header
LB: loop body
LE: loop exit
PB: predicated region body
PF: predicated region fallthrough
CT: control target
= control target key end

     0   :  { %s2507_s0 = inlined_call_operand.hbm [shape: f32[2,256,256], index: 0, kind: input, shape index: {}]   ;;  %s2508_s1 = inlined_call_operand.hbm [shape: bf16[256,256], index: 1, kind: input, shape index: {}]   ;;  %s2509_s2 = inlined_call_operand.hbm [shape: bf16[128,256], index: 2, kind: input, shape index: {}]   ;;  %s2510_s3 = inlined_call_operand.vmem [shape: bf16[1,128], index: 3, kind: input, shape index: {}]   ;;  %s2511_s4 = inlined_call_operand.hbm [shape: f32[2,1,256], index: 4, kind: output, shape index: {}]  }
   0x1   :  { %2512 = sst [smem:[#allocation16_spill]] %s2508_s1 }
   0x2   :  { %2513 = sst [smem:[#allocation17_spill]] %s2509_s2 }
   0x3   :  { %9 = vsyncpa [#allocation3], 0 }
   0x4   :  { %11 = vsyncpa [#allocation3 + $0x1], 0 }
   0x5   :  { %12 = vsyncpa [#allocation6], 0 }
   0x6   :  { %13 = vsyncpa [#allocation4], 0 }
   0x7   :  { %15 = vsyncpa [#allocation4 + $0x1], 0  ;;  %s2112_s15 = smov 0   ;;  %s2114_s16 = smov 0  }
   0x8   :  { %s2116_s17 = smov 0   ;;  %s2118_s18 = smov 0  }
   0x9   :  { %s2120_s19 = smov 0   ;;  %s2122_s20 = smov 0  }
   0xa LB: > { %s1547_s21 = sadd.s32 4294967295, %s2079_s20   ;;  %s1548_s22 = sadd.s32 4294967294, %s2079_s20   ;;  %s2079_s20 = sphi %s2122_s20, %s21_s20   ;;  %s2075_s19 = sphi %s2120_s19, %s2537_s19   ;;  %s2071_s18 = sphi %s2118_s18, %s2536_s18   ;;  %s2067_s17 = sphi %s2116_s17, %s2535_s17   ;;  %s2063_s16 = sphi %s2114_s16, %s2534_s16   ;;  %s2059_s15 = sphi %s2112_s15, %s2533_s15  }
   0xb   : > { %p55_p0 = scmp.ne.s32.totalorder %s2063_s16, %s2059_s15  ;;  %p2146_p1 = scmp.eq.s32.totalorder %s1547_s21, 0 }
   0xc   : > { %p2150_p2 = scmp.eq.s32.totalorder %s1547_s21, 1  ;;  %p150_p3 = scmp.eq.s32.totalorder %s1548_s22, 1 }
   0xd   : > { %p2156_p4 = por %p2146_p1, %p55_p0  ;;  %p1549_p5 = scmp.ge.s32.totalorder %s2079_s20, 1 }
   0xe   : > { %p2161_p6 = por %p150_p3, %p55_p0  ;;  %p157_p7 = scmp.lt.s32.totalorder %s2079_s20, 3 }
   0xf   : > { %s2518_s1 = sld [smem:[#allocation16_spill]]  ;;  %s2081_s5 = smov [#allocation5]  }
  0x10   : > { %p2169_p8 = pnand %p1549_p5, %p157_p7  ;;  %s170_s6 = sshll.u32 %s2081_s5, 4  ;;  %s171_s6 = int_to_ptr.vmem [resolvable:$true] %s170_s6 }
  0x11   : > { %p1552_p11 = scmp.ge.s32.totalorder %s2079_s20, 2  ;;  %s2520_s2 = sld [smem:[#allocation17_spill]] }
  0x12   : > { %p1820_p9 = pneg %p2169_p8  ;;  %s2082_s10 = smov 128  }
  0x13   : > { %s2083_s11 = smov 8   ;;  %s2084_s12 = smov [#allocation7]  }
  0x14   : > { %p1821_p10 = pnand %p1820_p9, %p2146_p1  ;;  %s184_s13 = sshll.u32 %s2084_s12, 4  ;;  %s185_s13 = int_to_ptr.vmem [resolvable:$true] %s184_s13 }
  0x15   : > { %s168_s29 = sshll.u32 %s2518_s1, 4  ;;  %s33_s14 = sadd.s32 1, %s2075_s19  ;;  %s169_s29 = int_to_ptr.hbm [resolvable:$true] %s168_s29 }
  0x16   : > { %1823 = dma.hbm_to_vmem [thread:$0]  (!%p1821_p10), %s169_s29, 4096, %s171_s6, [#allocation6], %s2082_s10, %s2082_s10, %s2083_s11  }
  0x17   : > { %s182_s9 = sshll.u32 %s2520_s2, 4  ;;  %s42_s21 = sadd.s32 1, %s2067_s17  ;;  %s183_s9 = int_to_ptr.hbm [resolvable:$true] %s182_s9 }
  0x18   : > { %1826 = dma.hbm_to_vmem [thread:$0]  (!%p1821_p10), %s183_s9, 2048, %s185_s13, [#allocation6], %s2082_s10, %s2082_s10, %s2083_s11  }
  0x19   : > { %p35_p12 = scmp.ge.s32.totalorder %s33_s14, 2  ;;  %p49_p13 = scmp.ne.s32.totalorder %s2067_s17, %s2063_s16 }
  0x1a   : > { %p50_p0 = scmp.eq.s32.totalorder %s2079_s20, 0  ;;  %p1837_p3 = scmp.lt.s32.totalorder %s2079_s20, 2 }
  0x1b   : > { %s2539_s14 = smov (%p35_p12, %s33_s14), 0  ;;  %p2195_p7 = por %p2150_p2, %p49_p13 }
  0x1c   : > { %p2189_p5 = por %p50_p0, %p49_p13  ;;  %s37_s28 = ssub.s32 %s2075_s19, %s2539_s14 }
  0x1d   : > { %s201_s29 = sand.u32 1, %s2067_s17   ;;  %p40_p9 = scmp.eq.s32.totalorder %s37_s28, 0 }
  0x1e   : > { %s1553_s5 = sshll.u32 %s201_s29, 9  ;;  %s1759_s6 = sshll.u32 %s2075_s19, 9 }
  0x1f   : > { %s2204_s7 = scalar_select %p40_p9, %s2067_s17, %s42_s21  }
  0x20   : > { %s212_s10 = scalar_lea.hbm %s2507_s0, %s1759_s6  ;;  %s205_s12 = scalar_lea.vmem [#allocation2], %s1553_s5 }
  0x21   : > { %s213_s11 = sshll.u32 %s212_s10, 4  ;;  %s215_s13 = sshll.u32 %s205_s12, 4  ;;  %s214_s11 = int_to_ptr.hbm [resolvable:$true] %s213_s11  ;;  %s216_s13 = int_to_ptr.vmem [resolvable:$true] %s215_s13 }
  0x22   : > { %p1828_p2 = pnand %p1837_p3, %p2189_p5  ;;  %s202_s24 = scalar_lea.sflag [#allocation3], %s201_s29 }
  0x23   : > { %s2085_s1 = smov 256   ;;  %s2086_s2 = smov 16  }
  0x24   : > { %1830 = dma.hbm_to_vmem [thread:$0]  (!%p1828_p2), %s214_s11, 8192, %s216_s13, %s202_s24, %s2085_s1, %s2085_s1, %s2086_s2  }
  0x25   : > { %227 = sbr.rel (%p2169_p8) target bundleno = 951 (0x3b7), region = 36 }
  0x2a   : > { %s2216_s21 = sand.u32 1, %s2063_s16  }
  0x2b   : > { %s1557_s28 = sshll.u32 %s2216_s21, 9  ;;  %s230_s5 = scalar_lea.sflag [#allocation3], %s2216_s21 }
  0x2c   : > { %s2220_s6 = scalar_lea.vmem [#allocation2], %s1557_s28 }
  0x2d   : > { %2046 = dma.done.wait (%p2156_p4), %s230_s5, 8192  }
  0x2e   : > { %2048 = vsyncadd (%p2156_p4), %s230_s5, 4294959104 }
  0x2f   : > { %2050 = dma.done.wait (%p2146_p1), [#allocation6], 6144  }
  0x30   : > { %2052 = vsyncadd (%p2146_p1), [#allocation6], 4294961152  ;;  %v299_v0 = vld [vmem:[%s2220_s6 + $0xe0] sm:$0xff]  ;;  %v301_v1 = vld [vmem:[%s2220_s6 + $0xf0] sm:$0xff]  ;;  %s1560_s23 = sshll.u32 %s2216_s21, 1  ;;  %s1756_s25 = sshll.u32 %s2071_s18, 1 }
  0x31   : > { %v331_v2 = vld [vmem:[%s2220_s6 + $0x1e0] sm:$0xff]  ;;  %v349_v3 = vpack.c.bf16 %v301_v1, %v299_v0  ;;  %v333_v4 = vld [vmem:[%s2220_s6 + $0x1f0] sm:$0xff]  ;;  %v300_v5 = vld [vmem:[%s2220_s6 + $0xe8] sm:$0xff]  ;;  %s1440_s29 = scalar_lea.hbm %s2511_s4, %s1756_s25  ;;  %s268_s18 = scalar_lea.vmem [#allocation8], %s1560_s23  ;;  %vm1419_vm8 = vcmask 1040384  }
  0x32   : > { %v302_v6 = vld [vmem:[%s2220_s6 + $0xf8] sm:$0xff]  ;;  %v365_v7 = vpack.c.bf16 %v333_v4, %v331_v2  ;;  %v332_v9 = vld [vmem:[%s2220_s6 + $0x1e8] sm:$0xff]  ;;  %v295_v11 = vld [vmem:[%s2220_s6 + $0xc0] sm:$0xff]  ;;  %s1442_s8 = sshll.u32 %s268_s18, 4  ;;  %s1444_s9 = sshll.u32 %s1440_s29, 4  ;;  %s1443_s8 = int_to_ptr.vmem [resolvable:$true] %s1442_s8  ;;  %s1445_s9 = int_to_ptr.hbm [resolvable:$true] %s1444_s9 }
  0x33   : > { %v350_v8 = vpack.c.bf16 %v302_v6, %v300_v5  ;;  %v334_v10 = vld [vmem:[%s2220_s6 + $0x1f8] sm:$0xff]  ;;  %559 = vmatpush.bf16.msra.mxu0 %v349_v3  ;;  %v297_v13 = vld [vmem:[%s2220_s6 + $0xd0] sm:$0xff]  ;;  %v327_v14 = vld [vmem:[%s2220_s6 + $0x1c0] sm:$0xff]  ;;  %s1428_s10 = scalar_lea.sflag [#allocation4], %s2216_s21  ;;  %s2007_s11 = sshra.s32 %s1445_s9, 4  ;;  %s2008_s11 = int_to_ptr.hbm [resolvable:$true] %s2007_s11 }
  0x34   : > { %v366_v12 = vpack.c.bf16 %v334_v10, %v332_v9  ;;  %v329_v15 = vld [vmem:[%s2220_s6 + $0x1d0] sm:$0xff]  ;;  %648 = vmatpush.bf16.msra.mxu1 %v365_v7  ;;  %v347_v16 = vpack.c.bf16 %v297_v13, %v295_v11  ;;  %v296_v18 = vld [vmem:[%s2220_s6 + $0xc8] sm:$0xff]  ;;  %v298_v19 = vld [vmem:[%s2220_s6 + $0xd8] sm:$0xff]  ;;  %s2009_s12 = scalar_lea.hbm %s2008_s11, 2  ;;  %s2013_s28 = scalar_lea.hbm %s2511_s4, 4 }
  0x35   : > { %737 = vmatpush.bf16.msra.mxu2 %v350_v8  ;;  %v363_v17 = vpack.c.bf16 %v329_v15, %v327_v14  ;;  %v328_v20 = vld [vmem:[%s2220_s6 + $0x1c8] sm:$0xff]  ;;  %v348_v21 = vpack.c.bf16 %v298_v19, %v296_v18  ;;  %v330_v22 = vld [vmem:[%s2220_s6 + $0x1d8] sm:$0xff]  ;;  %v291_v23 = vld [vmem:[%s2220_s6 + $0xa0] sm:$0xff]  ;;  %p2010_p1 = scmp.ne.s32.totalorder %s2008_s11, %s2009_s12  ;;  %p2014_p10 = scmp.lt.s32.totalorder %s2008_s11, %s2511_s4 }
  0x36   : > { %826 = vmatpush.bf16.msra.mxu3 %v366_v12  ;;  %v293_v24 = vld [vmem:[%s2220_s6 + $0xb0] sm:$0xff]  ;;  %v364_v25 = vpack.c.bf16 %v330_v22, %v328_v20  ;;  %v323_v26 = vld [vmem:[%s2220_s6 + $0x1a0] sm:$0xff]  ;;  %v292_v28 = vld [vmem:[%s2220_s6 + $0xa8] sm:$0xff]  ;;  %p2015_p12 = scmp.lt.s32.totalorder %s2013_s28, %s2009_s12 }
  0x37   : > { %v325_v27 = vld [vmem:[%s2220_s6 + $0x1b0] sm:$0xff]  ;;  %560 = vmatpush.bf16.msra.mxu0 %v347_v16  ;;  %v345_v29 = vpack.c.bf16 %v293_v24, %v291_v23  ;;  %v294_v30 = vld [vmem:[%s2220_s6 + $0xb8] sm:$0xff]  ;;  %v324_v31 = vld [vmem:[%s2220_s6 + $0x1a8] sm:$0xff]  ;;  %p2011_p4 = pnand %p2010_p1, %p2195_p7 }
  0x38   : > { %v326_v32 = vld [vmem:[%s2220_s6 + $0x1b8] sm:$0xff]  ;;  %649 = vmatpush.bf16.msra.mxu1 %v363_v17  ;;  %v361_v33 = vpack.c.bf16 %v325_v27, %v323_v26  ;;  %v346_v34 = vpack.c.bf16 %v294_v30, %v292_v28  ;;  %v287_v35 = vld [vmem:[%s2220_s6 + $0x80] sm:$0xff]  ;;  %v289_v36 = vld [vmem:[%s2220_s6 + $0x90] sm:$0xff]  ;;  %p2016_p13 = por %p2015_p12, %p2014_p10 }
  0x39   : > { %738 = vmatpush.bf16.msra.mxu2 %v348_v21  ;;  %v319_v37 = vld [vmem:[%s2220_s6 + $0x180] sm:$0xff]  ;;  %v362_v38 = vpack.c.bf16 %v326_v32, %v324_v31  ;;  %v321_v39 = vld [vmem:[%s2220_s6 + $0x190] sm:$0xff]  ;;  %v288_v40 = vld [vmem:[%s2220_s6 + $0x88] sm:$0xff]  ;;  %v343_v44 = vpack.c.bf16 %v289_v36, %v287_v35  ;;  %p2012_p8 = pneg %p2011_p4 }
  0x3a   : > { %827 = vmatpush.bf16.msra.mxu3 %v364_v25  ;;  %v290_v41 = vld [vmem:[%s2220_s6 + $0x98] sm:$0xff]  ;;  %v320_v42 = vld [vmem:[%s2220_s6 + $0x188] sm:$0xff]  ;;  %v359_v45 = vpack.c.bf16 %v321_v39, %v319_v37  ;;  %v283_v47 = vld [vmem:[%s2220_s6 + $0x60] sm:$0xff] }
  0x3b   : > { %v322_v43 = vld [vmem:[%s2220_s6 + $0x198] sm:$0xff]  ;;  %561 = vmatpush.bf16.msra.mxu0 %v345_v29  ;;  %v344_v46 = vpack.c.bf16 %v290_v41, %v288_v40  ;;  %v285_v48 = vld [vmem:[%s2220_s6 + $0x70] sm:$0xff]  ;;  %v315_v49 = vld [vmem:[%s2220_s6 + $0x160] sm:$0xff]  ;;  %p2017_p0 = pnand %p2016_p13, %p2012_p8 }
  0x3c   : > { %650 = vmatpush.bf16.msra.mxu1 %v361_v33  ;;  %v360_v50 = vpack.c.bf16 %v322_v43, %v320_v42  ;;  %v317_v51 = vld [vmem:[%s2220_s6 + $0x170] sm:$0xff]  ;;  %v284_v52 = vld [vmem:[%s2220_s6 + $0x68] sm:$0xff]  ;;  %v286_v53 = vld [vmem:[%s2220_s6 + $0x78] sm:$0xff]  ;;  %v341_v56 = vpack.c.bf16 %v285_v48, %v283_v47 }
  0x3d   : > { %739 = vmatpush.bf16.msra.mxu2 %v346_v34  ;;  %v316_v54 = vld [vmem:[%s2220_s6 + $0x168] sm:$0xff]  ;;  %v318_v55 = vld [vmem:[%s2220_s6 + $0x178] sm:$0xff]  ;;  %v357_v57 = vpack.c.bf16 %v317_v51, %v315_v49  ;;  %v342_v58 = vpack.c.bf16 %v286_v53, %v284_v52  ;;  %v279_v59 = vld [vmem:[%s2220_s6 + $0x40] sm:$0xff] }
  0x3e   : > { %828 = vmatpush.bf16.msra.mxu3 %v362_v38  ;;  %v281_v60 = vld [vmem:[%s2220_s6 + $0x50] sm:$0xff]  ;;  %v311_v61 = vld [vmem:[%s2220_s6 + $0x140] sm:$0xff]  ;;  %v358_v62 = vpack.c.bf16 %v318_v55, %v316_v54  ;;  %v280_v0 = vld [vmem:[%s2220_s6 + $0x48] sm:$0xff] }
  0x3f   : > { %562 = vmatpush.bf16.msra.mxu0 %v343_v44  ;;  %v313_v63 = vld [vmem:[%s2220_s6 + $0x150] sm:$0xff]  ;;  %v282_v1 = vld [vmem:[%s2220_s6 + $0x58] sm:$0xff]  ;;  %v312_v2 = vld [vmem:[%s2220_s6 + $0x148] sm:$0xff]  ;;  %v339_v4 = vpack.c.bf16 %v281_v60, %v279_v59 }
  0x40   : > { %651 = vmatpush.bf16.msra.mxu1 %v359_v45  ;;  %v314_v3 = vld [vmem:[%s2220_s6 + $0x158] sm:$0xff]  ;;  %v355_v5 = vpack.c.bf16 %v313_v63, %v311_v61  ;;  %v340_v6 = vpack.c.bf16 %v282_v1, %v280_v0  ;;  %v275_v7 = vld [vmem:[%s2220_s6 + $0x20] sm:$0xff]  ;;  %v277_v8 = vld [vmem:[%s2220_s6 + $0x30] sm:$0xff] }
  0x41   : > { %740 = vmatpush.bf16.msra.mxu2 %v344_v46  ;;  %v307_v9 = vld [vmem:[%s2220_s6 + $0x120] sm:$0xff]  ;;  %v356_v10 = vpack.c.bf16 %v314_v3, %v312_v2  ;;  %v309_v11 = vld [vmem:[%s2220_s6 + $0x130] sm:$0xff]  ;;  %v276_v12 = vld [vmem:[%s2220_s6 + $0x28] sm:$0xff]  ;;  %v337_v16 = vpack.c.bf16 %v277_v8, %v275_v7 }
  0x42   : > { %829 = vmatpush.bf16.msra.mxu3 %v360_v50  ;;  %v278_v13 = vld [vmem:[%s2220_s6 + $0x38] sm:$0xff]  ;;  %v308_v14 = vld [vmem:[%s2220_s6 + $0x128] sm:$0xff]  ;;  %v353_v17 = vpack.c.bf16 %v309_v11, %v307_v9  ;;  %v271_v19 = vld [vmem:[%s2220_s6] sm:$0xff] }
  0x43   : > { %563 = vmatpush.bf16.msra.mxu0 %v341_v56  ;;  %v310_v15 = vld [vmem:[%s2220_s6 + $0x138] sm:$0xff]  ;;  %v338_v18 = vpack.c.bf16 %v278_v13, %v276_v12  ;;  %v273_v20 = vld [vmem:[%s2220_s6 + $0x10] sm:$0xff]  ;;  %v303_v21 = vld [vmem:[%s2220_s6 + $0x100] sm:$0xff] }
  0x44   : > { %652 = vmatpush.bf16.msra.mxu1 %v357_v57  ;;  %v354_v22 = vpack.c.bf16 %v310_v15, %v308_v14  ;;  %v305_v23 = vld [vmem:[%s2220_s6 + $0x110] sm:$0xff]  ;;  %v272_v24 = vld [vmem:[%s2220_s6 + $0x8] sm:$0xff]  ;;  %v274_v25 = vld [vmem:[%s2220_s6 + $0x18] sm:$0xff]  ;;  %v335_v28 = vpack.c.bf16 %v273_v20, %v271_v19 }
  0x45   : > { %741 = vmatpush.bf16.msra.mxu2 %v342_v58  ;;  %v304_v26 = vld [vmem:[%s2220_s6 + $0x108] sm:$0xff]  ;;  %v306_v27 = vld [vmem:[%s2220_s6 + $0x118] sm:$0xff]  ;;  %v1563_v29 = vld [vmem:[#allocation5] sm:$0xf]  ;;  %v351_v31 = vpack.c.bf16 %v305_v23, %v303_v21  ;;  %v336_v32 = vpack.c.bf16 %v274_v25, %v272_v24 }
  0x46   : > { %830 = vmatpush.bf16.msra.mxu3 %v358_v62  ;;  %v1761_v30 = vld [vmem:[#allocation5 + $0x4] sm:$0xf0]  ;;  %v1760_v33 = vld [vmem:[#allocation5 + $0x4] sm:$0xf]  ;;  %v1565_v34 = vld [vmem:[#allocation5 + $0x8] sm:$0xf0]  ;;  %v352_v35 = vpack.c.bf16 %v306_v27, %v304_v26 }
  0x47   : > { %564 = vmatpush.bf16.msra.mxu0 %v339_v4  ;;  %v1564_v36 = vor.u32 %v1761_v30, %v1563_v29  ;;  %v1568_v37 = vor.u32 %v1760_v33, %v1565_v34  ;;  %v1571_v38 = vld [vmem:[#allocation5 + $0x10] sm:$0xf]  ;;  %v1763_v39 = vld [vmem:[#allocation5 + $0x14] sm:$0xf0]  ;;  %v1762_v40 = vld [vmem:[#allocation5 + $0x14] sm:$0xf] }
  0x48   : > { %653 = vmatpush.bf16.msra.mxu1 %v355_v5  ;;  %v1573_v41 = vld [vmem:[#allocation5 + $0x18] sm:$0xf0]  ;;  %v1572_v42 = vor.u32 %v1763_v39, %v1571_v38  ;;  %v1579_v44 = vld [vmem:[#allocation5 + $0x20] sm:$0xf]  ;;  %v1765_v45 = vld [vmem:[#allocation5 + $0x24] sm:$0xf0] }
  0x49   : > { %742 = vmatpush.bf16.msra.mxu2 %v340_v6  ;;  %v1576_v43 = vor.u32 %v1762_v40, %v1573_v41  ;;  %v1764_v46 = vld [vmem:[#allocation5 + $0x24] sm:$0xf]  ;;  %v1581_v47 = vld [vmem:[#allocation5 + $0x28] sm:$0xf0]  ;;  %v1580_v48 = vor.u32 %v1765_v45, %v1579_v44  ;;  %v1587_v50 = vld [vmem:[#allocation5 + $0x30] sm:$0xf] }
  0x4a   : > { %831 = vmatpush.bf16.msra.mxu3 %v356_v10  ;;  %v1584_v49 = vor.u32 %v1764_v46, %v1581_v47  ;;  %v1767_v51 = vld [vmem:[#allocation5 + $0x34] sm:$0xf0]  ;;  %v1766_v52 = vld [vmem:[#allocation5 + $0x34] sm:$0xf]  ;;  %v1589_v53 = vld [vmem:[#allocation5 + $0x38] sm:$0xf0] }
  0x4b   : > { %565 = vmatpush.bf16.msra.mxu0 %v337_v16  ;;  %v1588_v54 = vor.u32 %v1767_v51, %v1587_v50  ;;  %v1592_v55 = vor.u32 %v1766_v52, %v1589_v53  ;;  %v1595_v56 = vld [vmem:[#allocation5 + $0x40] sm:$0xf]  ;;  %v1769_v57 = vld [vmem:[#allocation5 + $0x44] sm:$0xf0]  ;;  %v1768_v58 = vld [vmem:[#allocation5 + $0x44] sm:$0xf] }
  0x4c   : > { %654 = vmatpush.bf16.msra.mxu1 %v353_v17  ;;  %v1597_v59 = vld [vmem:[#allocation5 + $0x48] sm:$0xf0]  ;;  %v1596_v60 = vor.u32 %v1769_v57, %v1595_v56  ;;  %v1603_v62 = vld [vmem:[#allocation5 + $0x50] sm:$0xf]  ;;  %v1771_v63 = vld [vmem:[#allocation5 + $0x54] sm:$0xf0] }
  0x4d   : > { %743 = vmatpush.bf16.msra.mxu2 %v338_v18  ;;  %v1600_v61 = vor.u32 %v1768_v58, %v1597_v59  ;;  %v1770_v0 = vld [vmem:[#allocation5 + $0x54] sm:$0xf]  ;;  %v1605_v1 = vld [vmem:[#allocation5 + $0x58] sm:$0xf0]  ;;  %v1604_v2 = vor.u32 %v1771_v63, %v1603_v62  ;;  %v1611_v4 = vld [vmem:[#allocation5 + $0x60] sm:$0xf] }
  0x4e   : > { %832 = vmatpush.bf16.msra.mxu3 %v354_v22  ;;  %v1608_v3 = vor.u32 %v1770_v0, %v1605_v1  ;;  %v1773_v5 = vld [vmem:[#allocation5 + $0x64] sm:$0xf0]  ;;  %v1772_v6 = vld [vmem:[#allocation5 + $0x64] sm:$0xf]  ;;  %v1613_v7 = vld [vmem:[#allocation5 + $0x68] sm:$0xf0] }
  0x4f   : > { %566 = vmatpush.bf16.msra.mxu0 %v335_v28  ;;  %v1612_v8 = vor.u32 %v1773_v5, %v1611_v4  ;;  %v1616_v9 = vor.u32 %v1772_v6, %v1613_v7  ;;  %v1619_v10 = vld [vmem:[#allocation5 + $0x70] sm:$0xf]  ;;  %v1775_v11 = vld [vmem:[#allocation5 + $0x74] sm:$0xf0]  ;;  %v1774_v12 = vld [vmem:[#allocation5 + $0x74] sm:$0xf] }
  0x50   : > { %655 = vmatpush.bf16.msra.mxu1 %v351_v31  ;;  %v1621_v13 = vld [vmem:[#allocation5 + $0x78] sm:$0xf0]  ;;  %v1620_v14 = vor.u32 %v1775_v11, %v1619_v10  ;;  %v1627_v16 = vld [vmem:[#allocation5 + $0x80] sm:$0xf]  ;;  %v1777_v17 = vld [vmem:[#allocation5 + $0x84] sm:$0xf0] }
  0x51   : > { %744 = vmatpush.bf16.msra.mxu2 %v336_v32  ;;  %v1624_v15 = vor.u32 %v1774_v12, %v1621_v13  ;;  %v1776_v18 = vld [vmem:[#allocation5 + $0x84] sm:$0xf]  ;;  %v1629_v19 = vld [vmem:[#allocation5 + $0x88] sm:$0xf0]  ;;  %v1628_v20 = vor.u32 %v1777_v17, %v1627_v16  ;;  %v1635_v33 = vld [vmem:[#allocation5 + $0x90] sm:$0xf] }
  0x52   : > { %833 = vmatpush.bf16.msra.mxu3 %v352_v35  ;;  %567 = vmatmul.bf16.vlgmr.msra.gmra.mxu0 %v1564_v36  ;;  %v1632_v22 = vor.u32 %v1776_v18, %v1629_v19  ;;  %v1779_v34 = vld [vmem:[#allocation5 + $0x94] sm:$0xf0]  ;;  %v1778_v35 = vld [vmem:[#allocation5 + $0x94] sm:$0xf]  ;;  %v1643_v57 = vld [vmem:[#allocation5 + $0xa0] sm:$0xf] }
  0x53   : > { %656 = vmatmul.bf16.vlgmr.msra.gmra.mxu1 %v1568_v37  ;;  %v1636_v39 = vor.u32 %v1779_v34, %v1635_v33  ;;  %v1781_v58 = vld [vmem:[#allocation5 + $0xa4] sm:$0xf0]  ;;  %v1780_v59 = vld [vmem:[#allocation5 + $0xa4] sm:$0xf]  ;;  %v1651_v17 = vld [vmem:[#allocation5 + $0xb0] sm:$0xf] }
  0x54   : > { %745 = vmatmul.bf16.vlgmr.msra.gmra.mxu2 %v1564_v36  ;;  %v1637_v36 = vld [vmem:[#allocation5 + $0x98] sm:$0xf0]  ;;  %v1644_v63 = vor.u32 %v1781_v58, %v1643_v57  ;;  %v1783_v18 = vld [vmem:[#allocation5 + $0xb4] sm:$0xf0]  ;;  %v1782_v19 = vld [vmem:[#allocation5 + $0xb4] sm:$0xf] }
  0x55   : > { %834 = vmatmul.bf16.vlgmr.msra.gmra.mxu3 %v1568_v37 }
  0x62   : > { %572 = vmatmul.bf16.gmra.mxu0 %v1572_v42 }
  0x63   : > { %661 = vmatmul.bf16.gmra.mxu1 %v1576_v43 }
  0x64   : > { %750 = vmatmul.bf16.gmra.mxu2 %v1572_v42  ;;  %v1640_v42 = vor.u32 %v1778_v35, %v1637_v36 }
  0x65   : > { %839 = vmatmul.bf16.gmra.mxu3 %v1576_v43 }
  0x72   : > { %577 = vmatmul.bf16.gmra.mxu0 %v1580_v48 }
  0x73   : > { %666 = vmatmul.bf16.gmra.mxu1 %v1584_v49 }
  0x74   : > { %755 = vmatmul.bf16.gmra.mxu2 %v1580_v48 }
  0x75   : > { %844 = vmatmul.bf16.gmra.mxu3 %v1584_v49 }
  0x82   : > { %582 = vmatmul.bf16.gmra.mxu0 %v1588_v54 }
  0x83   : > { %671 = vmatmul.bf16.gmra.mxu1 %v1592_v55 }
  0x84   : > { %760 = vmatmul.bf16.gmra.mxu2 %v1588_v54 }
  0x85   : > { %849 = vmatmul.bf16.gmra.mxu3 %v1592_v55 }
  0x92   : > { %587 = vmatmul.bf16.gmra.mxu0 %v1596_v60 }
  0x93   : > { %676 = vmatmul.bf16.gmra.mxu1 %v1600_v61 }
  0x94   : > { %765 = vmatmul.bf16.gmra.mxu2 %v1596_v60  ;;  %v1645_v60 = vld [vmem:[#allocation5 + $0xa8] sm:$0xf0] }
  0x95   : > { %854 = vmatmul.bf16.gmra.mxu3 %v1600_v61 }
  0xa2   : > { %592 = vmatmul.bf16.gmra.mxu0 %v1604_v2 }
  0xa3   : > { %681 = vmatmul.bf16.gmra.mxu1 %v1608_v3 }
  0xa4   : > { %770 = vmatmul.bf16.gmra.mxu2 %v1604_v2  ;;  %v1648_v2 = vor.u32 %v1780_v59, %v1645_v60 }
  0xa5   : > { %859 = vmatmul.bf16.gmra.mxu3 %v1608_v3 }
  0xb2   : > { %597 = vmatmul.bf16.gmra.mxu0 %v1612_v8 }
  0xb3   : > { %686 = vmatmul.bf16.gmra.mxu1 %v1616_v9 }
  0xb4   : > { %775 = vmatmul.bf16.gmra.mxu2 %v1612_v8 }
  0xb5   : > { %864 = vmatmul.bf16.gmra.mxu3 %v1616_v9 }
  0xc2   : > { %602 = vmatmul.bf16.gmra.mxu0 %v1620_v14 }
  0xc3   : > { %691 = vmatmul.bf16.gmra.mxu1 %v1624_v15 }
  0xc4   : > { %780 = vmatmul.bf16.gmra.mxu2 %v1620_v14 }
  0xc5   : > { %869 = vmatmul.bf16.gmra.mxu3 %v1624_v15 }
  0xcf   : > { %v568_v21 = vpop.f32.mrf.mxu0 }
  0xd0   : > { %v657_v23 = vpop.f32.mrf.mxu1 }
  0xd1   : > { %v658_v24 = vadd.f32 %v657_v23, %v568_v21  ;;  %v1652_v23 = vor.u32 %v1783_v18, %v1651_v17  ;;  %v1789_v17 = vld [vmem:[#allocation5 + $0xe4] sm:$0xf0]  ;;  %v1788_v18 = vld [vmem:[#allocation5 + $0xe4] sm:$0xf] }
  0xd2   : > { %607 = vmatmul.bf16.gmra.mxu0 %v1628_v20 }
  0xd3   : > { %696 = vmatmul.bf16.gmra.mxu1 %v1632_v22  ;;  %v915_v30 = vmax.f32 %v658_v24, 0.0 }
  0xd4   : > { %785 = vmatmul.bf16.gmra.mxu2 %v1628_v20  ;;  %v1653_v20 = vld [vmem:[#allocation5 + $0xb8] sm:$0xf0] }
  0xd5   : > { %874 = vmatmul.bf16.gmra.mxu3 %v1632_v22 }
  0xd7   : > { %v746_v25 = vpop.f32.mrf.mxu2  ;;  %v570_v27 = vpop.f32.mrf.mxu0 }
  0xd8   : > { %v835_v26 = vpop.f32.mrf.mxu3  ;;  %v659_v29 = vpop.f32.mrf.mxu1 }
  0xd9   : > { %v836_v28 = vadd.f32 %v835_v26, %v746_v25  ;;  %v660_v31 = vadd.f32 %v659_v29, %v570_v27  ;;  %v1656_v26 = vor.u32 %v1782_v19, %v1653_v20  ;;  %v1677_v19 = vld [vmem:[#allocation5 + $0xe8] sm:$0xf0] }
  0xdb   : > { %v917_v32 = vmax.f32 %v660_v31, 0.0  ;;  %v916_v46 = vmax.f32 %v836_v28, 0.0 }
  0xdd   : > { %v2294_v37 = vpack.c.bf16 %v917_v32, %v915_v30 }
  0xdf   : > { %v748_v38 = vpop.f32.mrf.mxu2  ;;  %v573_v41 = vpop.f32.mrf.mxu0 }
  0xe0   : > { %v837_v40 = vpop.f32.mrf.mxu3  ;;  %v662_v44 = vpop.f32.mrf.mxu1 }
  0xe1   : > { %v838_v43 = vadd.f32 %v837_v40, %v748_v38  ;;  %v663_v45 = vadd.f32 %v662_v44, %v573_v41  ;;  %v1784_v44 = vld [vmem:[#allocation5 + $0xc4] sm:$0xf] }
  0xe2   : > { %612 = vmatmul.bf16.gmra.mxu0 %v1636_v39 }
  0xe3   : > { %v918_v47 = vmax.f32 %v838_v43, 0.0  ;;  %701 = vmatmul.bf16.gmra.mxu1 %v1640_v42  ;;  %v919_v54 = vmax.f32 %v663_v45, 0.0  ;;  %v1785_v43 = vld [vmem:[#allocation5 + $0xc4] sm:$0xf0]  ;;  %v1661_v45 = vld [vmem:[#allocation5 + $0xc8] sm:$0xf0] }
  0xe4   : > { %790 = vmatmul.bf16.gmra.mxu2 %v1636_v39 }
  0xe5   : > { %879 = vmatmul.bf16.gmra.mxu3 %v1640_v42  ;;  %v2296_v48 = vpack.c.bf16 %v918_v47, %v916_v46  ;;  %v1659_v42 = vld [vmem:[#allocation5 + $0xc0] sm:$0xf] }
  0xe7   : > { %v751_v49 = vpop.f32.mrf.mxu2  ;;  %v575_v51 = vpop.f32.mrf.mxu0 }
  0xe8   : > { %v840_v50 = vpop.f32.mrf.mxu3  ;;  %v664_v53 = vpop.f32.mrf.mxu1 }
  0xe9   : > { %v841_v52 = vadd.f32 %v840_v50, %v751_v49  ;;  %v665_v55 = vadd.f32 %v664_v53, %v575_v51  ;;  %v1660_v49 = vor.u32 %v1785_v43, %v1659_v42 }
  0xeb   : > { %v921_v56 = vmax.f32 %v665_v55, 0.0  ;;  %v920_v6 = vmax.f32 %v841_v52, 0.0  ;;  %v1664_v52 = vor.u32 %v1784_v44, %v1661_v45 }
  0xed   : > { %v2298_v61 = vpack.c.bf16 %v921_v56, %v919_v54 }
  0xef   : > { %v753_v62 = vpop.f32.mrf.mxu2  ;;  %v578_v1 = vpop.f32.mrf.mxu0 }
  0xf0   : > { %v842_v0 = vpop.f32.mrf.mxu3  ;;  %v667_v4 = vpop.f32.mrf.mxu1 }
  0xf1   : > { %v843_v3 = vadd.f32 %v842_v0, %v753_v62  ;;  %v668_v5 = vadd.f32 %v667_v4, %v578_v1  ;;  %v1667_v1 = vld [vmem:[#allocation5 + $0xd0] sm:$0xf]  ;;  %v1669_v4 = vld [vmem:[#allocation5 + $0xd8] sm:$0xf0] }
  0xf2   : > { %617 = vmatmul.bf16.gmra.mxu0 %v1644_v63 }
  0xf3   : > { %v922_v7 = vmax.f32 %v843_v3, 0.0  ;;  %706 = vmatmul.bf16.gmra.mxu1 %v1648_v2  ;;  %v923_v14 = vmax.f32 %v668_v5, 0.0  ;;  %v1786_v3 = vld [vmem:[#allocation5 + $0xd4] sm:$0xf] }
  0xf4   : > { %795 = vmatmul.bf16.gmra.mxu2 %v1644_v63 }
  0xf5   : > { %884 = vmatmul.bf16.gmra.mxu3 %v1648_v2  ;;  %v2300_v8 = vpack.c.bf16 %v922_v7, %v920_v6  ;;  %v1787_v2 = vld [vmem:[#allocation5 + $0xd4] sm:$0xf0] }
  0xf6   : > { %v1668_v6 = vor.u32 %v1787_v2, %v1667_v1 }
  0xf7   : > { %v756_v9 = vpop.f32.mrf.mxu2  ;;  %v580_v11 = vpop.f32.mrf.mxu0 }
  0xf8   : > { %v845_v10 = vpop.f32.mrf.mxu3  ;;  %v669_v13 = vpop.f32.mrf.mxu1 }
  0xf9   : > { %v846_v12 = vadd.f32 %v845_v10, %v756_v9  ;;  %v670_v15 = vadd.f32 %v669_v13, %v580_v11  ;;  %v1672_v10 = vor.u32 %v1786_v3, %v1669_v4 }
  0xfb   : > { %v925_v16 = vmax.f32 %v670_v15, 0.0  ;;  %v924_v30 = vmax.f32 %v846_v12, 0.0 }
  0xfd   : > { %v2302_v21 = vpack.c.bf16 %v925_v16, %v923_v14  ;;  %v1675_v16 = vld [vmem:[#allocation5 + $0xe0] sm:$0xf] }
  0xff   : > { %v758_v22 = vpop.f32.mrf.mxu2  ;;  %v583_v25 = vpop.f32.mrf.mxu0 }
 0x100   : > { %v847_v24 = vpop.f32.mrf.mxu3  ;;  %v672_v28 = vpop.f32.mrf.mxu1 }
 0x101   : > { %v848_v27 = vadd.f32 %v847_v24, %v758_v22  ;;  %v673_v29 = vadd.f32 %v672_v28, %v583_v25  ;;  %v1676_v22 = vor.u32 %v1789_v17, %v1675_v16  ;;  %v1680_v25 = vor.u32 %v1788_v18, %v1677_v19 }
 0x102   : > { %622 = vmatmul.bf16.gmra.mxu0 %v1652_v23 }
 0x103   : > { %v926_v31 = vmax.f32 %v848_v27, 0.0  ;;  %711 = vmatmul.bf16.gmra.mxu1 %v1656_v26  ;;  %v927_v39 = vmax.f32 %v673_v29, 0.0 }
 0x104   : > { %800 = vmatmul.bf16.gmra.mxu2 %v1652_v23 }
 0x105   : > { %889 = vmatmul.bf16.gmra.mxu3 %v1656_v26  ;;  %v2304_v32 = vpack.c.bf16 %v926_v31, %v924_v30  ;;  %v1683_v31 = vld [vmem:[#allocation5 + $0xf0] sm:$0xf] }
 0x107   : > { %v761_v33 = vpop.f32.mrf.mxu2  ;;  %v585_v35 = vpop.f32.mrf.mxu0 }
 0x108   : > { %v850_v34 = vpop.f32.mrf.mxu3  ;;  %v674_v38 = vpop.f32.mrf.mxu1 }
 0x109   : > { %v851_v36 = vadd.f32 %v850_v34, %v761_v33  ;;  %v675_v40 = vadd.f32 %v674_v38, %v585_v35  ;;  %v1791_v33 = vld [vmem:[#allocation5 + $0xf4] sm:$0xf0]  ;;  %v1790_v34 = vld [vmem:[#allocation5 + $0xf4] sm:$0xf]  ;;  %v1685_v35 = vld [vmem:[#allocation5 + $0xf8] sm:$0xf0] }
 0x10a   : > { %v1684_v38 = vor.u32 %v1791_v33, %v1683_v31 }
 0x10b   : > { %v929_v41 = vmax.f32 %v675_v40, 0.0  ;;  %v928_v56 = vmax.f32 %v851_v36, 0.0 }
 0x10d   : > { %v2306_v46 = vpack.c.bf16 %v929_v41, %v927_v39  ;;  %v1688_v41 = vor.u32 %v1790_v34, %v1685_v35 }
 0x10f   : > { %v763_v47 = vpop.f32.mrf.mxu2  ;;  %v588_v51 = vpop.f32.mrf.mxu0 }
 0x110   : > { %v852_v50 = vpop.f32.mrf.mxu3  ;;  %v677_v54 = vpop.f32.mrf.mxu1 }
 0x111   : > { %v853_v53 = vadd.f32 %v852_v50, %v763_v47  ;;  %v2308_v55 = vadd.f32 %v677_v54, %v588_v51 }
 0x112   : > { %627 = vmatmul.bf16.gmra.mxu0 %v1660_v49 }
 0x113   : > { %v930_v57 = vmax.f32 %v853_v53, 0.0  ;;  %716 = vmatmul.bf16.gmra.mxu1 %v1664_v52 }
 0x114   : > { %805 = vmatmul.bf16.gmra.mxu2 %v1660_v49 }
 0x115   : > { %894 = vmatmul.bf16.gmra.mxu3 %v1664_v52  ;;  %v2310_v58 = vpack.c.bf16 %v930_v57, %v928_v56 }
 0x117   : > { %v766_v59 = vpop.f32.mrf.mxu2  ;;  %v2312_v62 = vpop.f32.mrf.mxu0 }
 0x118   : > { %v855_v60 = vpop.f32.mrf.mxu3  ;;  %v2316_v0 = vpop.f32.mrf.mxu1 }
 0x119   : > { %v2314_v63 = vadd.f32 %v855_v60, %v766_v59 }
 0x11f   : > { %v2318_v5 = vpop.f32.mrf.mxu2  ;;  %v593_v9 = vpop.f32.mrf.mxu0 }
 0x120   : > { %v2320_v7 = vpop.f32.mrf.mxu3  ;;  %v682_v11 = vpop.f32.mrf.mxu1 }
 0x121   : > { %v683_v56 = vadd.f32 %v682_v11, %v593_v9 }
 0x122   : > { %632 = vmatmul.bf16.gmra.mxu0 %v1668_v6 }
 0x123   : > { %721 = vmatmul.bf16.gmra.mxu1 %v1672_v10  ;;  %v935_v19 = vmax.f32 %v683_v56, 0.0 }
 0x124   : > { %810 = vmatmul.bf16.gmra.mxu2 %v1668_v6 }
 0x125   : > { %899 = vmatmul.bf16.gmra.mxu3 %v1672_v10  ;;  %v680_v10 = vadd.f32 %v2316_v0, %v2312_v62 }
 0x127   : > { %v2322_v12 = vpop.f32.mrf.mxu2  ;;  %v595_v14 = vpop.f32.mrf.mxu0  ;;  %v933_v31 = vmax.f32 %v680_v10, 0.0 }
 0x128   : > { %v2324_v13 = vpop.f32.mrf.mxu3  ;;  %v684_v15 = vpop.f32.mrf.mxu1 }
 0x129   : > { %v685_v57 = vadd.f32 %v684_v15, %v595_v14  ;;  %v861_v62 = vadd.f32 %v2324_v13, %v2322_v12 }
 0x12f   : > { %v773_v20 = vpop.f32.mrf.mxu2  ;;  %v598_v24 = vpop.f32.mrf.mxu0 }
 0x130   : > { %v862_v23 = vpop.f32.mrf.mxu3  ;;  %v687_v26 = vpop.f32.mrf.mxu1 }
 0x131   : > { %v688_v50 = vadd.f32 %v687_v26, %v598_v24 }
 0x132   : > { %637 = vmatmul.bf16.gmra.mxu0 %v1676_v22 }
 0x133   : > { %726 = vmatmul.bf16.gmra.mxu1 %v1680_v25  ;;  %v939_v59 = vmax.f32 %v688_v50, 0.0 }
 0x134   : > { %815 = vmatmul.bf16.gmra.mxu2 %v1676_v22  ;;  %v937_v22 = vmax.f32 %v685_v57, 0.0 }
 0x135   : > { %904 = vmatmul.bf16.gmra.mxu3 %v1680_v25  ;;  %v863_v25 = vadd.f32 %v862_v23, %v773_v20 }
 0x136   : > { %v989_v33 = vpack.c.bf16 %v937_v22, %v935_v19 }
 0x137   : > { %v776_v27 = vpop.f32.mrf.mxu2  ;;  %v600_v29 = vpop.f32.mrf.mxu0  ;;  %v938_v20 = vmax.f32 %v863_v25, 0.0 }
 0x138   : > { %v865_v28 = vpop.f32.mrf.mxu3  ;;  %v689_v30 = vpop.f32.mrf.mxu1 }
 0x139   : > { %v690_v51 = vadd.f32 %v689_v30, %v600_v29  ;;  %v866_v11 = vadd.f32 %v865_v28, %v776_v27  ;;  %v931_v30 = vmax.f32 %v2308_v55, 0.0  ;;  %v858_v27 = vadd.f32 %v2320_v7, %v2318_v5 }
 0x13b   : > { %v941_v60 = vmax.f32 %v690_v51, 0.0  ;;  %v940_v0 = vmax.f32 %v866_v11, 0.0  ;;  %v934_v12 = vmax.f32 %v858_v27, 0.0 }
 0x13d   : > { %v991_v9 = vpack.c.bf16 %v941_v60, %v939_v59 }
 0x13f   : > { %v778_v36 = vpop.f32.mrf.mxu2  ;;  %v603_v40 = vpop.f32.mrf.mxu0 }
 0x140   : > { %v867_v39 = vpop.f32.mrf.mxu3  ;;  %v692_v42 = vpop.f32.mrf.mxu1 }
 0x141   : > { %v693_v43 = vadd.f32 %v692_v42, %v603_v40  ;;  %v868_v16 = vadd.f32 %v867_v39, %v778_v36  ;;  %v936_v39 = vmax.f32 %v861_v62, 0.0  ;;  %v932_v40 = vmax.f32 %v2314_v63, 0.0 }
 0x142   : > { %642 = vmatmul.bf16.gmra.mxu0 %v1684_v38 }
 0x143   : > { %731 = vmatmul.bf16.gmra.mxu1 %v1688_v41  ;;  %v943_v52 = vmax.f32 %v693_v43, 0.0  ;;  %v942_v26 = vmax.f32 %v868_v16, 0.0  ;;  %v990_v13 = vpack.c.bf16 %v938_v20, %v936_v39  ;;  %v988_v43 = vpack.c.bf16 %v934_v12, %v932_v40 }
 0x144   : > { %820 = vmatmul.bf16.gmra.mxu2 %v1684_v38  ;;  %v987_v38 = vpack.c.bf16 %v933_v31, %v931_v30 }
 0x145   : > { %909 = vmatmul.bf16.gmra.mxu3 %v1688_v41  ;;  %v992_v55 = vpack.c.bf16 %v942_v26, %v940_v0 }
 0x147   : > { %v781_v44 = vpop.f32.mrf.mxu2  ;;  %v605_v47 = vpop.f32.mrf.mxu0 }
 0x148   : > { %v870_v45 = vpop.f32.mrf.mxu3  ;;  %v694_v49 = vpop.f32.mrf.mxu1 }
 0x149   : > { %v695_v53 = vadd.f32 %v694_v49, %v605_v47  ;;  %v871_v2 = vadd.f32 %v870_v45, %v781_v44 }
 0x14b   : > { %v945_v54 = vmax.f32 %v695_v53, 0.0  ;;  %v944_v14 = vmax.f32 %v871_v2, 0.0 }
 0x14d   : > { %v993_v1 = vpack.c.bf16 %v945_v54, %v943_v52 }
 0x14f   : > { %v783_v3 = vpop.f32.mrf.mxu2  ;;  %1107 = vmatpush.bf16.msrb.mxu0 %v993_v1  ;;  %v608_v6 = vpop.f32.mrf.mxu0 }
 0x150   : > { %v872_v4 = vpop.f32.mrf.mxu3  ;;  %v697_v18 = vpop.f32.mrf.mxu1 }
 0x151   : > { %v873_v17 = vadd.f32 %v872_v4, %v783_v3  ;;  %v2328_v24 = vadd.f32 %v697_v18, %v608_v6 }
 0x153   : > { %v946_v15 = vmax.f32 %v873_v17, 0.0  ;;  %1108 = vmatpush.bf16.msrb.mxu0 %v991_v9 }
 0x155   : > { %v994_v29 = vpack.c.bf16 %v946_v15, %v944_v14 }
 0x157   : > { %1205 = vmatpush.bf16.msrb.mxu2 %v994_v29  ;;  %v786_v34 = vpop.f32.mrf.mxu2  ;;  %1109 = vmatpush.bf16.msrb.mxu0 %v989_v33  ;;  %v2333_v36 = vpop.f32.mrf.mxu0 }
 0x158   : > { %v875_v35 = vpop.f32.mrf.mxu3  ;;  %v2339_v28 = vpop.f32.mrf.mxu1 }
 0x159   : > { %v2337_v23 = vadd.f32 %v875_v35, %v786_v34 }
 0x15b   : > { %2523 = vst [vmem:[#allocation12_spill] sm:$0xff] %v2337_v23  ;;  %1206 = vmatpush.bf16.msrb.mxu2 %v992_v55  ;;  %1110 = vmatpush.bf16.msrb.mxu0 %v987_v38 }
 0x15f   : > { %1207 = vmatpush.bf16.msrb.mxu2 %v990_v13  ;;  %v2342_v41 = vpop.f32.mrf.mxu2  ;;  %1111 = vmatpush.bf16.msrb.mxu0 %v2306_v46  ;;  %v613_v5 = vpop.f32.mrf.mxu0 }
 0x160   : > { %2524 = vst [vmem:[#allocation13_spill] sm:$0xff] %v2342_v41  ;;  %v2344_v42 = vpop.f32.mrf.mxu3  ;;  %v702_v7 = vpop.f32.mrf.mxu1 }
 0x161   : > { %2525 = vst [vmem:[#allocation14_spill] sm:$0xff] %v2344_v42  ;;  %v2347_v44 = vadd.f32 %v702_v7, %v613_v5 }
 0x163   : > { %1208 = vmatpush.bf16.msrb.mxu2 %v988_v43  ;;  %1112 = vmatpush.bf16.msrb.mxu0 %v2302_v21 }
 0x167   : > { %1209 = vmatpush.bf16.msrb.mxu2 %v2310_v58  ;;  %v791_v45 = vpop.f32.mrf.mxu2  ;;  %1113 = vmatpush.bf16.msrb.mxu0 %v2298_v61  ;;  %v2352_v63 = vpop.f32.mrf.mxu0 }
 0x168   : > { %v880_v47 = vpop.f32.mrf.mxu3  ;;  %v2356_v50 = vpop.f32.mrf.mxu1 }
 0x169   : > { %v2354_v49 = vadd.f32 %v880_v47, %v791_v45 }
 0x16b   : > { %2526 = vst [vmem:[#allocation15_spill] sm:$0xff] %v2354_v49  ;;  %1210 = vmatpush.bf16.msrb.mxu2 %v2304_v32  ;;  %1114 = vmatpush.bf16.msrb.mxu0 %v2294_v37 }
 0x16f   : > { %1211 = vmatpush.bf16.msrb.mxu2 %v2300_v8  ;;  %v2361_v46 = vpop.f32.mrf.mxu2  ;;  %v618_v58 = vpop.f32.mrf.mxu0 }
 0x170   : > { %v2363_v21 = vpop.f32.mrf.mxu3  ;;  %v707_v51 = vpop.f32.mrf.mxu1 }
 0x171   : > { %v2365_v52 = vadd.f32 %v707_v51, %v618_v58 }
 0x173   : > { %1212 = vmatpush.bf16.msrb.mxu2 %v2296_v48 }
 0x177   : > { %v796_v61 = vpop.f32.mrf.mxu2  ;;  %v2368_v54 = vpop.f32.mrf.mxu0 }
 0x178   : > { %v885_v53 = vpop.f32.mrf.mxu3  ;;  %v2372_v32 = vpop.f32.mrf.mxu1 }
 0x179   : > { %v2370_v56 = vadd.f32 %v885_v53, %v796_v61 }
 0x17f   : > { %v2374_v37 = vpop.f32.mrf.mxu2  ;;  %v623_v57 = vpop.f32.mrf.mxu0 }
 0x180   : > { %v2376_v8 = vpop.f32.mrf.mxu3  ;;  %v712_v59 = vpop.f32.mrf.mxu1 }
 0x181   : > { %v2378_v60 = vadd.f32 %v712_v59, %v623_v57  ;;  %v1691_v59 = vld [vmem:[#allocation7] sm:$0xf] }
 0x187   : > { %v801_v1 = vpop.f32.mrf.mxu2  ;;  %v2380_v3 = vpop.f32.mrf.mxu0 }
 0x188   : > { %v890_v2 = vpop.f32.mrf.mxu3  ;;  %v2384_v4 = vpop.f32.mrf.mxu1 }
 0x189   : > { %v2382_v48 = vadd.f32 %v890_v2, %v801_v1  ;;  %v1793_v1 = vld [vmem:[#allocation7 + $0x4] sm:$0xf0] }
 0x18f   : > { %v2386_v6 = vpop.f32.mrf.mxu2  ;;  %v628_v16 = vpop.f32.mrf.mxu0 }
 0x190   : > { %v2388_v10 = vpop.f32.mrf.mxu3  ;;  %v717_v17 = vpop.f32.mrf.mxu1 }
 0x191   : > { %v2390_v18 = vadd.f32 %v717_v17, %v628_v16  ;;  %v1692_v16 = vor.u32 %v1793_v1, %v1691_v59 }
 0x193   : > { %1115 = vmatmul.bf16.vlgmr.msrb.gmra.mxu0 %v1692_v16  ;;  %1213 = vmatmul.bf16.vlgmr.msrb.gmra.mxu2 %v1692_v16  ;;  %v956_v16 = vmax.f32 %v2370_v56, 0.0 }
 0x197   : > { %v806_v19 = vpop.f32.mrf.mxu2  ;;  %v630_v9 = vpop.f32.mrf.mxu0 }
 0x198   : > { %v895_v22 = vpop.f32.mrf.mxu3  ;;  %v719_v14 = vpop.f32.mrf.mxu1 }
 0x199   : > { %v2392_v11 = vadd.f32 %v895_v22, %v806_v19 }
 0x19f   : > { %v2394_v15 = vpop.f32.mrf.mxu2  ;;  %v633_v26 = vpop.f32.mrf.mxu0 }
 0x1a0   : > { %v2396_v25 = vpop.f32.mrf.mxu3  ;;  %v722_v29 = vpop.f32.mrf.mxu1 }
 0x1a1   : > { %v723_v17 = vadd.f32 %v722_v29, %v633_v26 }
 0x1a7   : > { %v811_v30 = vpop.f32.mrf.mxu2  ;;  %v635_v33 = vpop.f32.mrf.mxu0 }
 0x1a8   : > { %v900_v31 = vpop.f32.mrf.mxu3  ;;  %v724_v62 = vpop.f32.mrf.mxu1 }
 0x1a9   : > { %v725_v19 = vadd.f32 %v724_v62, %v635_v33  ;;  %v715_v62 = vadd.f32 %v2384_v4, %v2380_v3  ;;  %v959_v3 = vmax.f32 %v2378_v60, 0.0  ;;  %v964_v60 = vmax.f32 %v2392_v11, 0.0 }
 0x1aa   : > { %v883_v11 = vadd.f32 %v2363_v21, %v2361_v46 }
 0x1ab   : > { %v961_v4 = vmax.f32 %v715_v62, 0.0 }
 0x1af   : > { %v813_v0 = vpop.f32.mrf.mxu2  ;;  %v638_v35 = vpop.f32.mrf.mxu0 }
 0x1b0   : > { %v902_v34 = vpop.f32.mrf.mxu3  ;;  %v727_v27 = vpop.f32.mrf.mxu1 }
 0x1b1   : > { %v728_v51 = vadd.f32 %v727_v27, %v638_v35  ;;  %v720_v27 = vadd.f32 %v719_v14, %v630_v9  ;;  %v903_v26 = vadd.f32 %v902_v34, %v813_v0  ;;  %v1699_v9 = vld [vmem:[#allocation7 + $0x10] sm:$0xf]  ;;  %v1795_v14 = vld [vmem:[#allocation7 + $0x14] sm:$0xf0] }
 0x1b3   : > { %v971_v22 = vmax.f32 %v728_v51, 0.0  ;;  %v970_v0 = vmax.f32 %v903_v26, 0.0  ;;  %v888_v51 = vadd.f32 %v2376_v8, %v2374_v37  ;;  %v947_v37 = vmax.f32 %v2328_v24, 0.0  ;;  %v1794_v26 = vld [vmem:[#allocation7 + $0x14] sm:$0xf] }
 0x1b5   : > { %v958_v59 = vmax.f32 %v888_v51, 0.0  ;;  %v1804_v51 = vld [vmem:[#allocation7 + $0x64] sm:$0xf] }
 0x1b7   : > { %v816_v20 = vpop.f32.mrf.mxu2  ;;  %v640_v38 = vpop.f32.mrf.mxu0 }
 0x1b8   : > { %v905_v55 = vpop.f32.mrf.mxu3  ;;  %v729_v39 = vpop.f32.mrf.mxu1 }
 0x1b9   : > { %v730_v61 = vadd.f32 %v729_v39, %v640_v38  ;;  %v967_v38 = vmax.f32 %v723_v17, 0.0  ;;  %v969_v39 = vmax.f32 %v725_v19, 0.0  ;;  %v1693_v17 = vld [vmem:[#allocation7 + $0x8] sm:$0xf0]  ;;  %v2528_v19 = vld [vmem:[#allocation14_spill] sm:$0xff] }
 0x1bb   : > { %v973_v23 = vmax.f32 %v730_v61, 0.0 }
 0x1bf   : > { %v818_v12 = vpop.f32.mrf.mxu2  ;;  %v643_v40 = vpop.f32.mrf.mxu0 }
 0x1c0   : > { %v907_v13 = vpop.f32.mrf.mxu3  ;;  %v732_v5 = vpop.f32.mrf.mxu1 }
 0x1c1   : > { %v733_v7 = vadd.f32 %v732_v5, %v643_v40  ;;  %v908_v41 = vadd.f32 %v907_v13, %v818_v12  ;;  %v901_v12 = vadd.f32 %v900_v31, %v811_v30  ;;  %v893_v30 = vadd.f32 %v2388_v10, %v2386_v6 }
 0x1c2   : > { %v700_v10 = vadd.f32 %v2339_v28, %v2333_v36  ;;  %v1707_v36 = vld [vmem:[#allocation7 + $0x20] sm:$0xf]  ;;  %v1797_v28 = vld [vmem:[#allocation7 + $0x24] sm:$0xf0] }
 0x1c3   : > { %v975_v53 = vmax.f32 %v733_v7, 0.0  ;;  %v1007_v7 = vpack.c.bf16 %v973_v23, %v971_v22  ;;  %v974_v29 = vmax.f32 %v908_v41, 0.0  ;;  %v710_v23 = vadd.f32 %v2372_v32, %v2368_v54 }
 0x1c4   : > { %v898_v41 = vadd.f32 %v2396_v25, %v2394_v15  ;;  %v705_v54 = vadd.f32 %v2356_v50, %v2352_v63  ;;  %v955_v32 = vmax.f32 %v2365_v52, 0.0  ;;  %v1001_v25 = vpack.c.bf16 %v961_v4, %v959_v3  ;;  %v1739_v4 = vld [vmem:[#allocation7 + $0x60] sm:$0xf] }
 0x1c5   : > { %v957_v15 = vmax.f32 %v710_v23, 0.0  ;;  %v962_v61 = vmax.f32 %v893_v30, 0.0  ;;  %v951_v63 = vmax.f32 %v2347_v44, 0.0  ;;  %v949_v8 = vmax.f32 %v700_v10, 0.0  ;;  %v1792_v44 = vld [vmem:[#allocation7 + $0x4] sm:$0xf] }
 0x1c6   : > { %v966_v31 = vmax.f32 %v898_v41, 0.0  ;;  %v953_v50 = vmax.f32 %v705_v54, 0.0  ;;  %v1708_v21 = vor.u32 %v1797_v28, %v1707_v36  ;;  %v1696_v24 = vor.u32 %v1792_v44, %v1693_v17  ;;  %v1803_v23 = vld [vmem:[#allocation7 + $0x54] sm:$0xf0]  ;;  %v1798_v41 = vld [vmem:[#allocation7 + $0x34] sm:$0xf] }
 0x1c7   : > { %v821_v43 = vpop.f32.mrf.mxu2  ;;  %v645_v47 = vpop.f32.mrf.mxu0  ;;  %v999_v52 = vpack.c.bf16 %v957_v15, %v955_v32  ;;  %v995_v46 = vpack.c.bf16 %v949_v8, %v947_v37  ;;  %v1807_v54 = vld [vmem:[#allocation7 + $0x74] sm:$0xf0]  ;;  %v1802_v32 = vld [vmem:[#allocation7 + $0x54] sm:$0xf]  ;;  %v1733_v15 = vld [vmem:[#allocation7 + $0x58] sm:$0xf0] }
 0x1c8   : > { %v910_v45 = vpop.f32.mrf.mxu3  ;;  %v734_v58 = vpop.f32.mrf.mxu1  ;;  %v1004_v6 = vpack.c.bf16 %v966_v31, %v964_v60  ;;  %v1736_v60 = vor.u32 %v1802_v32, %v1733_v15 }
 0x1c9   : > { %v735_v57 = vadd.f32 %v734_v58, %v645_v47  ;;  %v911_v40 = vadd.f32 %v910_v45, %v821_v43  ;;  %v906_v47 = vadd.f32 %v905_v55, %v816_v20  ;;  %v963_v43 = vmax.f32 %v2390_v18, 0.0 }
 0x1ca   : > { %v965_v45 = vmax.f32 %v720_v27, 0.0  ;;  %v1700_v20 = vor.u32 %v1795_v14, %v1699_v9  ;;  %v968_v55 = vmax.f32 %v901_v12, 0.0  ;;  %v1709_v12 = vld [vmem:[#allocation7 + $0x28] sm:$0xf0]  ;;  %v1731_v14 = vld [vmem:[#allocation7 + $0x50] sm:$0xf] }
 0x1cb   : > { %v977_v2 = vmax.f32 %v735_v57, 0.0  ;;  %v976_v58 = vmax.f32 %v911_v40, 0.0  ;;  %v954_v40 = vmax.f32 %v883_v11, 0.0 }
 0x1cc   : > { %v1003_v18 = vpack.c.bf16 %v965_v45, %v963_v43  ;;  %v1006_v13 = vpack.c.bf16 %v970_v0, %v968_v55  ;;  %1120 = vmatmul.bf16.gmra.mxu0 %v1700_v20  ;;  %1218 = vmatmul.bf16.gmra.mxu2 %v1700_v20  ;;  %v1723_v43 = vld [vmem:[#allocation7 + $0x40] sm:$0xf]  ;;  %v1801_v45 = vld [vmem:[#allocation7 + $0x44] sm:$0xf0]  ;;  %v1717_v0 = vld [vmem:[#allocation7 + $0x38] sm:$0xf0] }
 0x1cd   : > { %v1009_v49 = vpack.c.bf16 %v977_v2, %v975_v53  ;;  %v960_v53 = vmax.f32 %v2382_v48, 0.0  ;;  %v997_v2 = vpack.c.bf16 %v953_v50, %v951_v63  ;;  %v2527_v48 = vld [vmem:[#allocation13_spill] sm:$0xff]  ;;  %v1720_v3 = vor.u32 %v1798_v41, %v1717_v0  ;;  %v1800_v20 = vld [vmem:[#allocation7 + $0x44] sm:$0xf]  ;;  %v1806_v50 = vld [vmem:[#allocation7 + $0x74] sm:$0xf] }
 0x1ce   : > { %v878_v22 = vadd.f32 %v2528_v19, %v2527_v48  ;;  %v1725_v55 = vld [vmem:[#allocation7 + $0x48] sm:$0xf0] }
 0x1cf   : > { %v823_v5 = vpop.f32.mrf.mxu2  ;;  %1156 = vmatpush.bf16.msrb.mxu1 %v1009_v49  ;;  %v1005_v49 = vpack.c.bf16 %v969_v39, %v967_v38  ;;  %v1002_v1 = vpack.c.bf16 %v962_v61, %v960_v53  ;;  %v2530_v39 = vld [vmem:[#allocation12_spill] sm:$0xff]  ;;  %v1728_v31 = vor.u32 %v1800_v20, %v1725_v55  ;;  %v1741_v61 = vld [vmem:[#allocation7 + $0x68] sm:$0xf0] }
 0x1d0   : > { %v912_v42 = vpop.f32.mrf.mxu3  ;;  %v950_v38 = vmax.f32 %v878_v22, 0.0 }
 0x1d1   : > { %v913_v35 = vadd.f32 %v912_v42, %v823_v5  ;;  %v972_v42 = vmax.f32 %v906_v47, 0.0  ;;  %v1000_v5 = vpack.c.bf16 %v958_v59, %v956_v16 }
 0x1d3   : > { %v978_v57 = vmax.f32 %v913_v35, 0.0  ;;  %1157 = vmatpush.bf16.msrb.mxu1 %v1007_v7  ;;  %v1008_v34 = vpack.c.bf16 %v974_v29, %v972_v42  ;;  %v2529_v35 = vld [vmem:[#allocation15_spill] sm:$0xff]  ;;  %v948_v7 = vmax.f32 %v2530_v39, 0.0  ;;  %v1724_v42 = vor.u32 %v1801_v45, %v1723_v43 }
 0x1d4   : > { %v952_v27 = vmax.f32 %v2529_v35, 0.0  ;;  %v1701_v29 = vld [vmem:[#allocation7 + $0x18] sm:$0xf0] }
 0x1d5   : > { %v1010_v33 = vpack.c.bf16 %v978_v57, %v976_v58  ;;  %v996_v47 = vpack.c.bf16 %v950_v38, %v948_v7  ;;  %v1715_v58 = vld [vmem:[#allocation7 + $0x30] sm:$0xf]  ;;  %v1799_v57 = vld [vmem:[#allocation7 + $0x34] sm:$0xf0]  ;;  %v1704_v62 = vor.u32 %v1794_v26, %v1701_v29 }
 0x1d6   : > { %v998_v56 = vpack.c.bf16 %v954_v40, %v952_v27 }
 0x1d7   : > { %1254 = vmatpush.bf16.msrb.mxu3 %v1010_v33  ;;  %1158 = vmatpush.bf16.msrb.mxu1 %v1005_v49  ;;  %v1716_v33 = vor.u32 %v1799_v57, %v1715_v58  ;;  %v1796_v49 = vld [vmem:[#allocation7 + $0x24] sm:$0xf] }
 0x1d8   : > { %v1712_v9 = vor.u32 %v1796_v49, %v1709_v12 }
 0x1db   : > { %1255 = vmatpush.bf16.msrb.mxu3 %v1008_v34  ;;  %1159 = vmatpush.bf16.msrb.mxu1 %v1003_v18  ;;  %v1732_v34 = vor.u32 %v1803_v23, %v1731_v14  ;;  %v1805_v18 = vld [vmem:[#allocation7 + $0x64] sm:$0xf0] }
 0x1dc   : > { %1125 = vmatmul.bf16.gmra.mxu0 %v1708_v21  ;;  %1223 = vmatmul.bf16.gmra.mxu2 %v1708_v21  ;;  %v1740_v30 = vor.u32 %v1805_v18, %v1739_v4 }
 0x1df   : > { %1256 = vmatpush.bf16.msrb.mxu3 %v1006_v13  ;;  %1160 = vmatpush.bf16.msrb.mxu1 %v1001_v25  ;;  %v1747_v13 = vld [vmem:[#allocation7 + $0x70] sm:$0xf] }
 0x1e0   : > { %v1748_v25 = vor.u32 %v1807_v54, %v1747_v13 }
 0x1e3   : > { %1257 = vmatpush.bf16.msrb.mxu3 %v1004_v6  ;;  %1161 = vmatpush.bf16.msrb.mxu1 %v999_v52  ;;  %v1744_v6 = vor.u32 %v1804_v51, %v1741_v61  ;;  %v1749_v52 = vld [vmem:[#allocation7 + $0x78] sm:$0xf0] }
 0x1e4   : > { %v1752_v53 = vor.u32 %v1806_v50, %v1749_v52 }
 0x1e7   : > { %1258 = vmatpush.bf16.msrb.mxu3 %v1002_v1  ;;  %1162 = vmatpush.bf16.msrb.mxu1 %v997_v2 }
 0x1eb   : > { %1259 = vmatpush.bf16.msrb.mxu3 %v1000_v5  ;;  %1163 = vmatpush.bf16.msrb.mxu1 %v995_v46 }
 0x1ec   : > { %1130 = vmatmul.bf16.gmra.mxu0 %v1716_v33  ;;  %1228 = vmatmul.bf16.gmra.mxu2 %v1716_v33 }
 0x1ee   : > { %1164 = vmatmul.bf16.vlgmr.msrb.gmra.mxu1 %v1696_v24 }
 0x1ef   : > { %1260 = vmatpush.bf16.msrb.mxu3 %v998_v56 }
 0x1f3   : > { %1261 = vmatpush.bf16.msrb.mxu3 %v996_v47 }
 0x1f6   : > { %1262 = vmatmul.bf16.vlgmr.msrb.gmra.mxu3 %v1696_v24 }
 0x1fc   : > { %1135 = vmatmul.bf16.gmra.mxu0 %v1724_v42  ;;  %1233 = vmatmul.bf16.gmra.mxu2 %v1724_v42 }
 0x1fe   : > { %1169 = vmatmul.bf16.gmra.mxu1 %v1704_v62 }
 0x206   : > { %1267 = vmatmul.bf16.gmra.mxu3 %v1704_v62 }
 0x20c   : > { %1140 = vmatmul.bf16.gmra.mxu0 %v1732_v34  ;;  %1238 = vmatmul.bf16.gmra.mxu2 %v1732_v34 }
 0x20e   : > { %1174 = vmatmul.bf16.gmra.mxu1 %v1712_v9 }
 0x210   : > { %v1116_v10 = vpop.f32.mrf.mxu0 }
 0x216   : > { %1272 = vmatmul.bf16.gmra.mxu3 %v1712_v9  ;;  %v1214_v11 = vpop.f32.mrf.mxu2 }
 0x218   : > { %v1118_v63 = vpop.f32.mrf.mxu0 }
 0x21c   : > { %1145 = vmatmul.bf16.gmra.mxu0 %v1740_v30  ;;  %1243 = vmatmul.bf16.gmra.mxu2 %v1740_v30 }
 0x21e   : > { %1179 = vmatmul.bf16.gmra.mxu1 %v1720_v3  ;;  %v1216_v1 = vpop.f32.mrf.mxu2 }
 0x226   : > { %1277 = vmatmul.bf16.gmra.mxu3 %v1720_v3 }
 0x22c   : > { %1150 = vmatmul.bf16.gmra.mxu0 %v1748_v25  ;;  %1248 = vmatmul.bf16.gmra.mxu2 %v1748_v25 }
 0x22e   : > { %1184 = vmatmul.bf16.gmra.mxu1 %v1728_v31 }
 0x236   : > { %1282 = vmatmul.bf16.gmra.mxu3 %v1728_v31 }
 0x23e   : > { %1189 = vmatmul.bf16.gmra.mxu1 %v1736_v60 }
 0x246   : > { %1287 = vmatmul.bf16.gmra.mxu3 %v1736_v60 }
 0x249   : > { %v1121_v59 = vpop.f32.mrf.mxu0 }
 0x24e   : > { %1194 = vmatmul.bf16.gmra.mxu1 %v1744_v6 }
 0x24f   : > { %v1219_v16 = vpop.f32.mrf.mxu2 }
 0x251   : > { %v1123_v37 = vpop.f32.mrf.mxu0 }
 0x256   : > { %1292 = vmatmul.bf16.gmra.mxu3 %v1744_v6 }
 0x257   : > { %v1221_v40 = vpop.f32.mrf.mxu2 }
 0x259   : > { %v1126_v28 = vpop.f32.mrf.mxu0 }
 0x25e   : > { %1199 = vmatmul.bf16.gmra.mxu1 %v1752_v53 }
 0x25f   : > { %v1224_v38 = vpop.f32.mrf.mxu2 }
 0x261   : > { %v1128_v35 = vpop.f32.mrf.mxu0 }
 0x266   : > { %1297 = vmatmul.bf16.gmra.mxu3 %v1752_v53 }
 0x267   : > { %v1226_v12 = vpop.f32.mrf.mxu2 }
 0x269   : > { %v1131_v29 = vpop.f32.mrf.mxu0 }
 0x26b   : > { %v1165_v8 = vpop.f32.mrf.mxu1 }
 0x26c   : > { %v1166_v2 = vadd.f32 %v1165_v8, %v1116_v10 }
 0x26e   : > { %v1303_v44 = vmax.f32 %v1166_v2, 0.0 }
 0x26f   : > { %v1229_v20 = vpop.f32.mrf.mxu2 }
 0x271   : > { %v1133_v14 = vpop.f32.mrf.mxu0 }
 0x273   : > { %v1167_v36 = vpop.f32.mrf.mxu1 }
 0x274   : > { %v1168_v17 = vadd.f32 %v1167_v36, %v1118_v63 }
 0x276   : > { %v1305_v48 = vmax.f32 %v1168_v17, 0.0 }
 0x277   : > { %v1231_v25 = vpop.f32.mrf.mxu2 }
 0x278   : > { %v2426_v19 = vpack.c.bf16 %v1305_v48, %v1303_v44 }
 0x279   : > { %v1263_v22 = vpop.f32.mrf.mxu3  ;;  %v1136_v54 = vpop.f32.mrf.mxu0 }
 0x27a   : > { %v1264_v5 = vadd.f32 %v1263_v22, %v1214_v11 }
 0x27b   : > { %v1170_v46 = vpop.f32.mrf.mxu1 }
 0x27c   : > { %v1171_v21 = vadd.f32 %v1170_v46, %v1121_v59  ;;  %v1304_v56 = vmax.f32 %v1264_v5, 0.0 }
 0x27e   : > { %v1307_v47 = vmax.f32 %v1171_v21, 0.0 }
 0x281   : > { %v1265_v27 = vpop.f32.mrf.mxu3  ;;  %v1138_v52 = vpop.f32.mrf.mxu0 }
 0x282   : > { %v1266_v24 = vadd.f32 %v1265_v27, %v1216_v1 }
 0x283   : > { %v1172_v7 = vpop.f32.mrf.mxu1 }
 0x284   : > { %v1306_v39 = vmax.f32 %v1266_v24, 0.0  ;;  %v1173_v58 = vadd.f32 %v1172_v7, %v1123_v37  ;;  %v1234_v37 = vpop.f32.mrf.mxu2 }
 0x286   : > { %v2428_v57 = vpack.c.bf16 %v1306_v39, %v1304_v56  ;;  %v1309_v26 = vmax.f32 %v1173_v58, 0.0 }
 0x288   : > { %v2430_v33 = vpack.c.bf16 %v1309_v26, %v1307_v47 }
 0x289   : > { %v1268_v62 = vpop.f32.mrf.mxu3 }
 0x28a   : > { %v1269_v43 = vadd.f32 %v1268_v62, %v1219_v16  ;;  %v1141_v16 = vpop.f32.mrf.mxu0 }
 0x28b   : > { %v1175_v45 = vpop.f32.mrf.mxu1 }
 0x28c   : > { %v1176_v49 = vadd.f32 %v1175_v45, %v1126_v28  ;;  %v1308_v23 = vmax.f32 %v1269_v43, 0.0  ;;  %v2442_v22 = vpop.f32.mrf.mxu2 }
 0x28e   : > { %v1311_v34 = vmax.f32 %v1176_v49, 0.0 }
 0x291   : > { %v1270_v42 = vpop.f32.mrf.mxu3 }
 0x292   : > { %v1271_v9 = vadd.f32 %v1270_v42, %v1221_v40  ;;  %v1143_v21 = vpop.f32.mrf.mxu0 }
 0x293   : > { %v1177_v0 = vpop.f32.mrf.mxu1 }
 0x294   : > { %v1310_v41 = vmax.f32 %v1271_v9, 0.0  ;;  %v1178_v3 = vadd.f32 %v1177_v0, %v1128_v35  ;;  %v1239_v27 = vpop.f32.mrf.mxu2 }
 0x296   : > { %v2432_v4 = vpack.c.bf16 %v1310_v41, %v1308_v23  ;;  %v1313_v18 = vmax.f32 %v1178_v3, 0.0 }
 0x298   : > { %v2434_v55 = vpack.c.bf16 %v1313_v18, %v1311_v34 }
 0x299   : > { %v1273_v30 = vpop.f32.mrf.mxu3 }
 0x29a   : > { %v1274_v31 = vadd.f32 %v1273_v30, %v1224_v38  ;;  %v1146_v56 = vpop.f32.mrf.mxu0 }
 0x29b   : > { %v1180_v13 = vpop.f32.mrf.mxu1 }
 0x29c   : > { %v1181_v32 = vadd.f32 %v1180_v13, %v1131_v29  ;;  %v1312_v51 = vmax.f32 %v1274_v31, 0.0  ;;  %v1241_v7 = vpop.f32.mrf.mxu2 }
 0x29e   : > { %v1315_v10 = vmax.f32 %v1181_v32, 0.0 }
 0x2a1   : > { %v1275_v15 = vpop.f32.mrf.mxu3 }
 0x2a2   : > { %v1276_v60 = vadd.f32 %v1275_v15, %v1226_v12  ;;  %v1148_v58 = vpop.f32.mrf.mxu0 }
 0x2a3   : > { %v1182_v6 = vpop.f32.mrf.mxu1 }
 0x2a4   : > { %v1314_v61 = vmax.f32 %v1276_v60, 0.0  ;;  %v1183_v63 = vadd.f32 %v1182_v6, %v1133_v14  ;;  %v1244_v29 = vpop.f32.mrf.mxu2 }
 0x2a6   : > { %v2436_v50 = vpack.c.bf16 %v1314_v61, %v1312_v51  ;;  %v1317_v53 = vmax.f32 %v1183_v63, 0.0 }
 0x2a8   : > { %v2438_v11 = vpack.c.bf16 %v1317_v53, %v1315_v10 }
 0x2a9   : > { %v1278_v59 = vpop.f32.mrf.mxu3 }
 0x2aa   : > { %v1279_v1 = vadd.f32 %v1278_v59, %v1229_v20  ;;  %v1151_v43 = vpop.f32.mrf.mxu0 }
 0x2ab   : > { %v1185_v8 = vpop.f32.mrf.mxu1 }
 0x2ac   : > { %v2440_v2 = vadd.f32 %v1185_v8, %v1136_v54  ;;  %v1316_v44 = vmax.f32 %v1279_v1, 0.0  ;;  %v1246_v12 = vpop.f32.mrf.mxu2 }
 0x2ae   : > { %v1319_v10 = vmax.f32 %v2440_v2, 0.0 }
 0x2b1   : > { %v1280_v36 = vpop.f32.mrf.mxu3 }
 0x2b2   : > { %v1281_v28 = vadd.f32 %v1280_v36, %v1231_v25  ;;  %v1153_v14 = vpop.f32.mrf.mxu0 }
 0x2b3   : > { %v1187_v48 = vpop.f32.mrf.mxu1 }
 0x2b4   : > { %v1318_v17 = vmax.f32 %v1281_v28, 0.0  ;;  %v1249_v20 = vpop.f32.mrf.mxu2  ;;  %v1188_v25 = vadd.f32 %v1187_v48, %v1138_v52 }
 0x2b6   : > { %v2444_v40 = vpack.c.bf16 %v1318_v17, %v1316_v44  ;;  %v1321_v63 = vmax.f32 %v1188_v25, 0.0 }
 0x2b8   : > { %v1343_v44 = vpack.c.bf16 %v1321_v63, %v1319_v10 }
 0x2b9   : > { %v1283_v5 = vpop.f32.mrf.mxu3 }
 0x2ba   : > { %v2446_v46 = vadd.f32 %v1283_v5, %v1234_v37 }
 0x2bb   : > { %v1190_v35 = vpop.f32.mrf.mxu1 }
 0x2bc   : > { %v1191_v30 = vadd.f32 %v1190_v35, %v1141_v16  ;;  %v1251_v59 = vpop.f32.mrf.mxu2 }
 0x2be   : > { %v1323_v60 = vmax.f32 %v1191_v30, 0.0 }
 0x2c1   : > { %v1285_v24 = vpop.f32.mrf.mxu3 }
 0x2c2   : > { %v1286_v2 = vadd.f32 %v1285_v24, %v2442_v22  ;;  %v1351_v22 = vld [vmem:[%s2510_s3] sm:$0x1] }
 0x2c3   : > { %v1192_v38 = vpop.f32.mrf.mxu1 }
 0x2c4   : > { %v1193_v31 = vadd.f32 %v1192_v38, %v1143_v21 }
 0x2c6   : > { %v1325_v51 = vmax.f32 %v1193_v31, 0.0 }
 0x2c8   : > { %v1345_v53 = vpack.c.bf16 %v1325_v51, %v1323_v60 }
 0x2c9   : > { %v1288_v39 = vpop.f32.mrf.mxu3 }
 0x2ca   : > { %v1289_v5 = vadd.f32 %v1288_v39, %v1239_v27 }
 0x2cb   : > { %v1195_v47 = vpop.f32.mrf.mxu1 }
 0x2cc   : > { %v1196_v41 = vadd.f32 %v1195_v47, %v1146_v56  ;;  %v1324_v56 = vmax.f32 %v1289_v5, 0.0  ;;  %v1322_v47 = vmax.f32 %v1286_v2, 0.0 }
 0x2ce   : > { %v1327_v13 = vmax.f32 %v1196_v41, 0.0 }
 0x2d1   : > { %v1290_v26 = vpop.f32.mrf.mxu3 }
 0x2d2   : > { %v1291_v17 = vadd.f32 %v1290_v26, %v1241_v7  ;;  %v1320_v7 = vmax.f32 %v2446_v46, 0.0 }
 0x2d3   : > { %v1197_v62 = vpop.f32.mrf.mxu1 }
 0x2d4   : > { %v1198_v0 = vadd.f32 %v1197_v62, %v1148_v58  ;;  %v1326_v35 = vmax.f32 %v1291_v17, 0.0  ;;  %v1344_v26 = vpack.c.bf16 %v1322_v47, %v1320_v7 }
 0x2d6   : > { %v1329_v54 = vmax.f32 %v1198_v0, 0.0  ;;  %v1346_v58 = vpack.c.bf16 %v1326_v35, %v1324_v56 }
 0x2d8   : > { %v1347_v61 = vpack.c.bf16 %v1329_v54, %v1327_v13 }
 0x2d9   : > { %v1293_v45 = vpop.f32.mrf.mxu3 }
 0x2da   : > { %v1294_v16 = vadd.f32 %v1293_v45, %v1244_v29 }
 0x2db   : > { %v1200_v49 = vpop.f32.mrf.mxu1 }
 0x2dc   : > { %v1201_v42 = vadd.f32 %v1200_v49, %v1151_v43  ;;  %v1328_v21 = vmax.f32 %v1294_v16, 0.0 }
 0x2de   : > { %v1331_v34 = vmax.f32 %v1201_v42, 0.0 }
 0x2e1   : > { %v1295_v9 = vpop.f32.mrf.mxu3 }
 0x2e2   : > { %v1296_v37 = vadd.f32 %v1295_v9, %v1246_v12 }
 0x2e3   : > { %v1202_v23 = vpop.f32.mrf.mxu1 }
 0x2e4   : > { %v1203_v3 = vadd.f32 %v1202_v23, %v1153_v14  ;;  %v1330_v52 = vmax.f32 %v1296_v37, 0.0 }
 0x2e6   : > { %v1333_v18 = vmax.f32 %v1203_v3, 0.0  ;;  %v1348_v38 = vpack.c.bf16 %v1330_v52, %v1328_v21  ;;  %v1422_v3 = vlaneseq }
 0x2e8   : > { %v1349_v32 = vpack.c.bf16 %v1333_v18, %v1331_v34  ;;  %vm1424_vm9 = vcmp.lt.s32.totalorder %v1422_v3, 256 }
 0x2e9   : > { %v1298_v15 = vpop.f32.mrf.mxu3 }
 0x2ea   : > { %1352 = vmatpush.bf16.msra.mxu0 %v1349_v32  ;;  %v1299_v6 = vadd.f32 %v1298_v15, %v1249_v20 }
 0x2ec   : > { %v1332_v36 = vmax.f32 %v1299_v6, 0.0 }
 0x2ee   : > { %1353 = vmatpush.bf16.msra.mxu0 %v1347_v61 }
 0x2f1   : > { %v1300_v1 = vpop.f32.mrf.mxu3 }
 0x2f2   : > { %v1301_v8 = vadd.f32 %v1300_v1, %v1251_v59  ;;  %1354 = vmatpush.bf16.msra.mxu0 %v1345_v53 }
 0x2f4   : > { %v1334_v28 = vmax.f32 %v1301_v8, 0.0 }
 0x2f6   : > { %v1350_v48 = vpack.c.bf16 %v1334_v28, %v1332_v36  ;;  %1355 = vmatpush.bf16.msra.mxu0 %v1343_v44 }
 0x2f8   : > { %1365 = vmatpush.bf16.msra.mxu1 %v1350_v48 }
 0x2fa   : > { %1356 = vmatpush.bf16.msra.mxu0 %v2438_v11 }
 0x2fc   : > { %1366 = vmatpush.bf16.msra.mxu1 %v1348_v38 }
 0x2fe   : > { %1357 = vmatpush.bf16.msra.mxu0 %v2434_v55 }
 0x300   : > { %1367 = vmatpush.bf16.msra.mxu1 %v1346_v58 }
 0x302   : > { %1358 = vmatpush.bf16.msra.mxu0 %v2430_v33 }
 0x304   : > { %1368 = vmatpush.bf16.msra.mxu1 %v1344_v26 }
 0x306   : > { %1359 = vmatpush.bf16.msra.mxu0 %v2426_v19 }
 0x308   : > { %1369 = vmatpush.bf16.msra.mxu1 %v2444_v40 }
 0x309   : > { %1360 = vmatmul.bf16.vlgmr.msra.gmra.mxu0 %v1351_v22 }
 0x30c   : > { %1370 = vmatpush.bf16.msra.mxu1 %v2436_v50 }
 0x310   : > { %1371 = vmatpush.bf16.msra.mxu1 %v2432_v4 }
 0x314   : > { %1372 = vmatpush.bf16.msra.mxu1 %v2428_v57 }
 0x317   : > { %1373 = vmatmul.bf16.vlgmr.msra.gmra.mxu1 %v1351_v22 }
 0x386   : > { %v1361_v55 = vpop.f32.mrf.mxu0 }
 0x387   : > { %v1753_v11 = vmul.f32 -1.442695, %v1361_v55 }
 0x389   : > { %1895 = vpow2.f32 %v1753_v11 }
 0x38e   : > { %v1363_v33 = vpop.f32.mrf.mxu0 }
 0x38f   : > { %v1896_v46 = vpop.eup %1895 }
 0x390   : > { %v1384_v19 = vadd.f32 1.0, %v1896_v46 }
 0x392   : > { %1897 = vrcp.f32 %v1384_v19  ;;  %vm1391_vm0 = vweird.f32 %v1384_v19  ;;  %v1397_v42 = vand.u32 2147483648, %v1384_v19  ;;  %v1395_v9 = vand.u32 2147483647, %v1384_v19 }
 0x394   : > { %v1374_v27 = vpop.f32.mrf.mxu1  ;;  %v1398_v20 = vor.u32 1.1754944e-38, %v1397_v42  ;;  %vm1396_vm7 = vcmp.eq.f32.partialorder %v1395_v9, 8.507059e+37 }
 0x395   : > { %v1754_v24 = vmul.f32 -1.442695, %v1374_v27 }
 0x397   : > { %1899 = vpow2.f32 %v1754_v24 }
 0x398   : > { %v1898_v40 = vpop.eup %1897 }
 0x399   : > { %v1387_v4 = vmul.f32 %v1898_v40, %v1384_v19  ;;  %vm1392_vm1 = vweird.f32 %v1898_v40 }
 0x39a   : > { %vm2464_vm3 = vmor %vm1391_vm0, %vm1392_vm1 }
 0x39b   : > { %v1388_v57 = vsub.f32 1.0, %v1387_v4 }
 0x39c   : > { %v1376_v39 = vpop.f32.mrf.mxu1 }
 0x39d   : > { %v1900_v50 = vpop.eup %1899  ;;  %v1389_v45 = vmul.f32 %v1898_v40, %v1388_v57 }
 0x39e   : > { %v1385_v29 = vadd.f32 1.0, %v1900_v50 }
 0x39f   : > { %v1390_v41 = vadd.f32 %v1898_v40, %v1389_v45 }
 0x3a0   : > { %1901 = vrcp.f32 %v1385_v29  ;;  %v1412_v12 = vand.u32 2147483648, %v1385_v29  ;;  %v1410_v23 = vand.u32 2147483647, %v1385_v29  ;;  %vm1406_vm4 = vweird.f32 %v1385_v29 }
 0x3a1   : > { %v1394_v30 = vsel %vm2464_vm3, %v1898_v40, %v1390_v41 }
 0x3a2   : > { %v1413_v18 = vor.u32 1.1754944e-38, %v1412_v12  ;;  %vm1411_vm6 = vcmp.eq.f32.partialorder %v1410_v23, 8.507059e+37  ;;  %v1399_v32 = vsel %vm1396_vm7, %v1398_v20, %v1394_v30 }
 0x3a6   : > { %v1902_v62 = vpop.eup %1901 }
 0x3a7   : > { %v1402_v43 = vmul.f32 %v1902_v62, %v1385_v29  ;;  %vm1407_vm2 = vweird.f32 %v1902_v62 }
 0x3a8   : > { %vm1408_vm5 = vmor %vm1406_vm4, %vm1407_vm2 }
 0x3a9   : > { %v1403_v49 = vsub.f32 1.0, %v1402_v43 }
 0x3ab   : > { %v1404_v14 = vmul.f32 %v1902_v62, %v1403_v49 }
 0x3ad   : > { %v1405_v34 = vadd.f32 %v1902_v62, %v1404_v14 }
 0x3af   : > { %v1409_v31 = vsel %vm1408_vm5, %v1902_v62, %v1405_v34 }
 0x3b0   : > { %v1414_v13 = vsel %vm1411_vm6, %v1413_v18, %v1409_v31 }
 0x3b1   : > { %v1418_v54 = vrot.slane %v1414_v13, 7 }
 0x3b3   : > { %v1420_v15 = vsel %vm1419_vm8, %v1399_v32, %v1418_v54 }
 0x3b4   : > { %1426 = vst.msk [vmem:[%s268_s18] sm:$0x3] %vm1424_vm9, %v1420_v15 }
 0x3b5   : > { %2020 = shalt.err (!%p2017_p0)
}
 0x3b6   : > { %1818 = dma.vmem_to_hbm [thread:$0]  (%p2195_p7), %s1443_s8, 32, %s1445_s9, %s1428_s10  }
 0x3b7 PF: > { %s1456_s21 = sand.u32 1, %s2059_s15   ;;  %p1832_p3 = pnand %p1552_p11, %p2161_p6 }
 0x3b8   : > { %s1457_s1 = scalar_lea.sflag [#allocation4], %s1456_s21 }
 0x3b9   : > { %p1833_p5 = pneg %p1832_p3 }
 0x3bb   : > { %2054 = dma.done.wait (%p1833_p5), %s1457_s1, 32  }
 0x3bc   : > { %2056 = vsyncadd (%p1833_p5), %s1457_s1, 4294967264  ;;  %s21_s20 = sadd.s32 1, %s2079_s20   ;;  %s2533_s15 = smov %s2063_s16 }
 0x3bd   : > { %p18_p9 = scmp.ge.s32.totalorder %s21_s20, 4   ;;  %s2534_s16 = smov %s2067_s17 }
 0x3be   : > { %s2535_s17 = smov %s2204_s7  ;;  %s2536_s18 = smov %s2075_s19 }
 0x3bf   : > { %s2537_s19 = smov %s2539_s14  ;;  %20 = sbr.rel (!%p18_p9) target bundleno = 10 (0xa), region = 89 }
 0x3c4   :  { %1463 = vsyncpa [#allocation3], 1 }
 0x3c5   :  { %1465 = vsyncpa [#allocation3 + $0x1], 1 }
 0x3c6   :  { %1466 = vsyncpa [#allocation6], 1 }
 0x3c7   :  { %1467 = vsyncpa [#allocation4], 1 }
 0x3c8   :  { %1469 = vsyncpa [#allocation4 + $0x1], 1 }

</bundles_post_ra>
